<compile_context>
chip_gen: v7x
topology: tpu7x:2x2x1
jax: 0.10.0
libtpu: 0.0.40
codegen_flags: <defaults>
</compile_context>

<pallas_src>
import jax
import jax.numpy as jnp
from jax import lax
from jax.experimental import pallas as pl
from jax.experimental.pallas import tpu as pltpu

N_TOTAL = 256 ** 2        # rows of the torch .view(256**2, -1)
LANES = 128
MIN_BLOCK_ROWS = 512
MAX_BLOCK_ROWS = 4096     # 2 MiB f32 per input per buffer (8 MiB worst case total)
EPS = 1e-8


def _pick_blocks(rows_total):
    """Few, fat blocks; >= 2 steps when possible so next-block DMA overlaps compute."""
    nblocks = 1
    while rows_total // nblocks > MAX_BLOCK_ROWS:
        nblocks *= 2
    if nblocks == 1 and rows_total // 2 >= MIN_BLOCK_ROWS:
        nblocks = 2
    return nblocks, rows_total // nblocks


def _npcc_pallas(x2d, y2d, n_channels, block_rows, nblocks):
    """Fused single-pass moments + channel combine + scalar loss in one pallas_call."""
    rows_total, lanes = x2d.shape
    groups_per_ch = lanes // n_channels          # lanes carrying each channel
    n_groups = nblocks * groups_per_ch           # (block, lane) groups per channel
    n_per_channel = n_groups * block_rows        # == 256**2

    def kernel(x_ref, y_ref, out_ref, acc_ref):
        i = pl.program_id(0)

        @pl.when(i == 0)
        def _():
            acc_ref[...] = jnp.zeros_like(acc_ref)

        x = x_ref[...].astype(jnp.float32)
        y = y_ref[...].astype(jnp.float32)
        inv_nb = 1.0 / block_rows

        # Single pass over the tile: raw per-lane sums.
        sx = jnp.sum(x, axis=0, keepdims=True)          # (1, 128)
        sy = jnp.sum(y, axis=0, keepdims=True)
        sxx = jnp.sum(x * x, axis=0, keepdims=True)
        syy = jnp.sum(y * y, axis=0, keepdims=True)
        sxy = jnp.sum(x * y, axis=0, keepdims=True)

        # Block-centered moments (exact identities) -> safe cross-block combine.
        mx = sx * inv_nb
        my = sy * inv_nb
        m2x = sxx - sx * mx
        m2y = syy - sy * my
        mxy = sxy - sx * my

        # Direct row accumulates (no concatenate / sublane shuffles).
        acc_ref[0:1, :] += mx
        acc_ref[1:2, :] += my
        acc_ref[2:3, :] += m2x
        acc_ref[3:4, :] += m2y
        acc_ref[4:5, :] += mxy
        acc_ref[5:6, :] += mx * mx
        acc_ref[6:7, :] += my * my
        acc_ref[7:8, :] += mx * my

        @pl.when(i == nblocks - 1)
        def _():
            acc = acc_ref[...]                          # (8, 128)

            # Lane -> channel folding: sum lanes {c, c+C, ...} per channel via a
            # tiny MXU matmul against a 0/1 grouping matrix (columns >= C are 0).
            lane = lax.broadcasted_iota(jnp.int32, (lanes, lanes), 0)
            col = lax.broadcasted_iota(jnp.int32, (lanes, lanes), 1)
            gmat = jnp.where((lane % n_channels == col) & (col < n_channels),
                             1.0, 0.0).astype(jnp.float32)
            t = jnp.dot(acc, gmat, preferred_element_type=jnp.float32)  # (8, 128)

            s_mx, s_my = t[0:1, :], t[1:2, :]
            s_m2x, s_m2y, s_mxy = t[2:3, :], t[3:4, :], t[4:5, :]
            s_mx2, s_my2, s_mxmy = t[5:6, :], t[6:7, :], t[7:8, :]

            # Exact within/between-group combination (equal group sizes).
            mx_c = s_mx * (1.0 / n_groups)
            my_c = s_my * (1.0 / n_groups)
            ssx = s_m2x + block_rows * (s_mx2 - n_groups * mx_c * mx_c)
            ssy = s_m2y + block_rows * (s_my2 - n_groups * my_c * my_c)
            sxy_c = s_mxy + block_rows * (s_mxmy - n_groups * mx_c * my_c)

            inv_n = 1.0 / n_per_channel
            var_x = ssx * inv_n
            var_y = ssy * inv_n
            cov = sxy_c * inv_n
            corr = cov * lax.rsqrt(var_x + EPS) * lax.rsqrt(var_y + EPS)

            # Columns >= C are exactly zero, so the lane sum sees only real channels.
            out_ref[...] = jnp.sum(corr, axis=1, keepdims=True) * (-1.0 / n_channels)

    bytes_in = 2 * rows_total * lanes * x2d.dtype.itemsize
    out = pl.pallas_call(
        kernel,
        out_shape=jax.ShapeDtypeStruct((1, 1), jnp.float32),
        grid_spec=pltpu.PrefetchScalarGridSpec(
            num_scalar_prefetch=0,
            grid=(nblocks,),
            in_specs=[
                pl.BlockSpec((block_rows, lanes), lambda i: (i, 0)),
                pl.BlockSpec((block_rows, lanes), lambda i: (i, 0)),
            ],
            out_specs=pl.BlockSpec((1, 1), lambda i: (0, 0)),
            scratch_shapes=[pltpu.VMEM((8, lanes), jnp.float32)],
        ),
        compiler_params=pltpu.CompilerParams(
            dimension_semantics=("arbitrary",)),   # grid axis is a reduction
        cost_estimate=pl.CostEstimate(
            flops=10 * rows_total * lanes,
            transcendentals=2 * n_channels,
            bytes_accessed=bytes_in + 4),
    )(x2d, y2d)
    return out[0, 0]


def npcc_ref(x, y):
    # Pure-JAX reference with exactly the torch NPCCloss algorithm (two-pass).
    xf = x.reshape(N_TOTAL, -1)
    yf = y.reshape(N_TOTAL, -1)
    x_mean = jnp.mean(xf, axis=0, keepdims=True)
    y_mean = jnp.mean(yf, axis=0, keepdims=True)
    vx = xf - x_mean
    vy = yf - y_mean
    c = jnp.mean(vx * vy, axis=0) / (
        jnp.sqrt(jnp.mean(vx ** 2, axis=0) + EPS)
        * jnp.sqrt(jnp.mean(vy ** 2, axis=0) + EPS))
    return jnp.mean(-c)


def npcc_loss(x, y):
    assert x.size == y.size and x.size % N_TOTAL == 0, "need 256**2 * C elements"
    n_channels = x.size // N_TOTAL

    if LANES % n_channels == 0:
        # Fast path: pure row-major flatten (zero-copy view).  Assumes the
        # standard contiguous NCHW layout so the flatten order matches
        # torch .view(256**2, -1); lane l then holds channel l % C.
        rows_total = x.size // LANES              # = 512 * C
        nblocks, block_rows = _pick_blocks(rows_total)
        x2d = x.reshape(rows_total, LANES)
        y2d = y.reshape(rows_total, LANES)
        return _npcc_pallas(x2d, y2d, n_channels, block_rows, nblocks)

    # TODO(synk): lane-major fast path needs 128 % C == 0; the general case
    # (e.g. C = 3) falls back to plain JAX instead of the old host-side
    # channel-major transpose (which cost more HBM traffic than the kernel).
    return npcc_ref(x, y)


if __name__ == "__main__":
    # NPCCloss hardcodes .view(256**2, -1); smallest sensible NCHW input:
    key = jax.random.PRNGKey(0)
    k1, k2 = jax.random.split(key)
    x = jax.random.uniform(k1, (1, 4, 256, 256), dtype=jnp.float32)
    y = jax.random.uniform(k2, (1, 4, 256, 256), dtype=jnp.float32)

    loss_fn = jax.jit(npcc_loss)
    out = jax.block_until_ready(loss_fn(x, y))
    ref = npcc_ref(x, y)
    assert jnp.allclose(out, ref, atol=2e-5, rtol=1e-5), (out, ref)
    print("KERNEL_OK")
</pallas_src>

<mosaic_0001>
module attributes {stable_mosaic.version = 11 : i64} {
  func.func @kernel(%arg0: i32, %arg1: memref<1024x128xf32, #tpu.memory_space<vmem>>, %arg2: memref<1024x128xf32, #tpu.memory_space<vmem>>, %arg3: memref<1x1xf32, #tpu.memory_space<vmem>>, %arg4: memref<8x128xf32, #tpu.memory_space<vmem>>) attributes {dimension_semantics = [#tpu.dimension_semantics<arbitrary>], iteration_bounds = array<i64: 2>, scalar_prefetch = 0 : i64, scratch_operands = 1 : i64, tpu.core_type = #tpu.core_type<tc>, window_params = [{transform_indices = @transform_0, window_bounds = array<i64: 1024, 128>}, {transform_indices = @transform_1, window_bounds = array<i64: 1024, 128>}, {pipeline_mode = #tpu.pipeline_mode<synchronous>, transform_indices = @transform_2, window_bounds = array<i64: 1, 1>}]} {
    %c0_i32 = arith.constant 0 : i32
    %0 = arith.cmpi eq, %arg0, %c0_i32 : i32
    %1 = arith.extui %0 : i1 to i32
    %c0_i32_0 = arith.constant 0 : i32
    %2 = arith.cmpi ne, %1, %c0_i32_0 : i32
    scf.if %2 {
      %cst_36 = arith.constant 0.000000e+00 : f32
      %58 = vector.broadcast %cst_36 : f32 to vector<8x128xf32>
      %c0_37 = arith.constant 0 : index
      %c0_38 = arith.constant 0 : index
      %59 = vector.load %arg4[%c0_37, %c0_38] : memref<8x128xf32, #tpu.memory_space<vmem>>, vector<8x128xf32>
      tpu.vector_store %arg4[%c0_37, %c0_38], %58 {strides = array<i32>} : memref<8x128xf32, #tpu.memory_space<vmem>>, vector<8x128xf32>,
    } else {
    }
    %c0 = arith.constant 0 : index
    %c0_1 = arith.constant 0 : index
    %3 = vector.load %arg1[%c0, %c0_1] : memref<1024x128xf32, #tpu.memory_space<vmem>>, vector<1024x128xf32>
    %c0_2 = arith.constant 0 : index
    %c0_3 = arith.constant 0 : index
    %4 = vector.load %arg2[%c0_2, %c0_3] : memref<1024x128xf32, #tpu.memory_space<vmem>>, vector<1024x128xf32>
    %cst = arith.constant dense<0.000000e+00> : vector<128xf32>
    %5 = vector.multi_reduction <add>, %3, %cst [0] : vector<1024x128xf32> to vector<128xf32>
    %6 = vector.shape_cast %5 : vector<128xf32> to vector<1x128xf32>
    %cst_4 = arith.constant dense<0.000000e+00> : vector<128xf32>
    %7 = vector.multi_reduction <add>, %4, %cst_4 [0] : vector<1024x128xf32> to vector<128xf32>
    %8 = vector.shape_cast %7 : vector<128xf32> to vector<1x128xf32>
    %9 = arith.mulf %3, %3 : vector<1024x128xf32>
    %cst_5 = arith.constant dense<0.000000e+00> : vector<128xf32>
    %10 = vector.multi_reduction <add>, %9, %cst_5 [0] : vector<1024x128xf32> to vector<128xf32>
    %11 = vector.shape_cast %10 : vector<128xf32> to vector<1x128xf32>
    %12 = arith.mulf %4, %4 : vector<1024x128xf32>
    %cst_6 = arith.constant dense<0.000000e+00> : vector<128xf32>
    %13 = vector.multi_reduction <add>, %12, %cst_6 [0] : vector<1024x128xf32> to vector<128xf32>
    %14 = vector.shape_cast %13 : vector<128xf32> to vector<1x128xf32>
    %15 = arith.mulf %3, %4 : vector<1024x128xf32>
    %cst_7 = arith.constant dense<0.000000e+00> : vector<128xf32>
    %16 = vector.multi_reduction <add>, %15, %cst_7 [0] : vector<1024x128xf32> to vector<128xf32>
    %17 = vector.shape_cast %16 : vector<128xf32> to vector<1x128xf32>
    %cst_8 = arith.constant 9.765625E-4 : f32
    %18 = vector.broadcast %cst_8 : f32 to vector<1x128xf32>
    %19 = arith.mulf %6, %18 : vector<1x128xf32>
    %cst_9 = arith.constant 9.765625E-4 : f32
    %20 = vector.broadcast %cst_9 : f32 to vector<1x128xf32>
    %21 = arith.mulf %8, %20 : vector<1x128xf32>
    %22 = arith.mulf %6, %19 : vector<1x128xf32>
    %23 = arith.subf %11, %22 : vector<1x128xf32>
    %24 = arith.mulf %8, %21 : vector<1x128xf32>
    %25 = arith.subf %14, %24 : vector<1x128xf32>
    %26 = arith.mulf %6, %21 : vector<1x128xf32>
    %27 = arith.subf %17, %26 : vector<1x128xf32>
    %c0_10 = arith.constant 0 : index
    %c0_11 = arith.constant 0 : index
    %28 = vector.load %arg4[%c0_10, %c0_11] : memref<8x128xf32, #tpu.memory_space<vmem>>, vector<1x128xf32>
    %29 = arith.addf %28, %19 : vector<1x128xf32>
    %c0_12 = arith.constant 0 : index
    %c0_13 = arith.constant 0 : index
    %30 = vector.load %arg4[%c0_12, %c0_13] : memref<8x128xf32, #tpu.memory_space<vmem>>, vector<1x128xf32>
    tpu.vector_store %arg4[%c0_12, %c0_13], %29 {strides = array<i32>} : memref<8x128xf32, #tpu.memory_space<vmem>>, vector<1x128xf32>,
    %c1 = arith.constant 1 : index
    %c0_14 = arith.constant 0 : index
    %31 = vector.load %arg4[%c1, %c0_14] : memref<8x128xf32, #tpu.memory_space<vmem>>, vector<1x128xf32>
    %32 = arith.addf %31, %21 : vector<1x128xf32>
    %c1_15 = arith.constant 1 : index
    %c0_16 = arith.constant 0 : index
    %33 = vector.load %arg4[%c1_15, %c0_16] : memref<8x128xf32, #tpu.memory_space<vmem>>, vector<1x128xf32>
    tpu.vector_store %arg4[%c1_15, %c0_16], %32 {strides = array<i32>} : memref<8x128xf32, #tpu.memory_space<vmem>>, vector<1x128xf32>,
    %c2 = arith.constant 2 : index
    %c0_17 = arith.constant 0 : index
    %34 = vector.load %arg4[%c2, %c0_17] : memref<8x128xf32, #tpu.memory_space<vmem>>, vector<1x128xf32>
    %35 = arith.addf %34, %23 : vector<1x128xf32>
    %c2_18 = arith.constant 2 : index
    %c0_19 = arith.constant 0 : index
    %36 = vector.load %arg4[%c2_18, %c0_19] : memref<8x128xf32, #tpu.memory_space<vmem>>, vector<1x128xf32>
    tpu.vector_store %arg4[%c2_18, %c0_19], %35 {strides = array<i32>} : memref<8x128xf32, #tpu.memory_space<vmem>>, vector<1x128xf32>,
    %c3 = arith.constant 3 : index
    %c0_20 = arith.constant 0 : index
    %37 = vector.load %arg4[%c3, %c0_20] : memref<8x128xf32, #tpu.memory_space<vmem>>, vector<1x128xf32>
    %38 = arith.addf %37, %25 : vector<1x128xf32>
    %c3_21 = arith.constant 3 : index
    %c0_22 = arith.constant 0 : index
    %39 = vector.load %arg4[%c3_21, %c0_22] : memref<8x128xf32, #tpu.memory_space<vmem>>, vector<1x128xf32>
    tpu.vector_store %arg4[%c3_21, %c0_22], %38 {strides = array<i32>} : memref<8x128xf32, #tpu.memory_space<vmem>>, vector<1x128xf32>,
    %c4 = arith.constant 4 : index
    %c0_23 = arith.constant 0 : index
    %40 = vector.load %arg4[%c4, %c0_23] : memref<8x128xf32, #tpu.memory_space<vmem>>, vector<1x128xf32>
    %41 = arith.addf %40, %27 : vector<1x128xf32>
    %c4_24 = arith.constant 4 : index
    %c0_25 = arith.constant 0 : index
    %42 = vector.load %arg4[%c4_24, %c0_25] : memref<8x128xf32, #tpu.memory_space<vmem>>, vector<1x128xf32>
    tpu.vector_store %arg4[%c4_24, %c0_25], %41 {strides = array<i32>} : memref<8x128xf32, #tpu.memory_space<vmem>>, vector<1x128xf32>,
    %c5 = arith.constant 5 : index
    %c0_26 = arith.constant 0 : index
    %43 = vector.load %arg4[%c5, %c0_26] : memref<8x128xf32, #tpu.memory_space<vmem>>, vector<1x128xf32>
    %44 = arith.mulf %19, %19 : vector<1x128xf32>
    %45 = arith.addf %43, %44 : vector<1x128xf32>
    %c5_27 = arith.constant 5 : index
    %c0_28 = arith.constant 0 : index
    %46 = vector.load %arg4[%c5_27, %c0_28] : memref<8x128xf32, #tpu.memory_space<vmem>>, vector<1x128xf32>
    tpu.vector_store %arg4[%c5_27, %c0_28], %45 {strides = array<i32>} : memref<8x128xf32, #tpu.memory_space<vmem>>, vector<1x128xf32>,
    %c6 = arith.constant 6 : index
    %c0_29 = arith.constant 0 : index
    %47 = vector.load %arg4[%c6, %c0_29] : memref<8x128xf32, #tpu.memory_space<vmem>>, vector<1x128xf32>
    %48 = arith.mulf %21, %21 : vector<1x128xf32>
    %49 = arith.addf %47, %48 : vector<1x128xf32>
    %c6_30 = arith.constant 6 : index
    %c0_31 = arith.constant 0 : index
    %50 = vector.load %arg4[%c6_30, %c0_31] : memref<8x128xf32, #tpu.memory_space<vmem>>, vector<1x128xf32>
    tpu.vector_store %arg4[%c6_30, %c0_31], %49 {strides = array<i32>} : memref<8x128xf32, #tpu.memory_space<vmem>>, vector<1x128xf32>,
    %c7 = arith.constant 7 : index
    %c0_32 = arith.constant 0 : index
    %51 = vector.load %arg4[%c7, %c0_32] : memref<8x128xf32, #tpu.memory_space<vmem>>, vector<1x128xf32>
    %52 = arith.mulf %19, %21 : vector<1x128xf32>
    %53 = arith.addf %51, %52 : vector<1x128xf32>
    %c7_33 = arith.constant 7 : index
    %c0_34 = arith.constant 0 : index
    %54 = vector.load %arg4[%c7_33, %c0_34] : memref<8x128xf32, #tpu.memory_space<vmem>>, vector<1x128xf32>
    tpu.vector_store %arg4[%c7_33, %c0_34], %53 {strides = array<i32>} : memref<8x128xf32, #tpu.memory_space<vmem>>, vector<1x128xf32>,
    %c1_i32 = arith.constant 1 : i32
    %55 = arith.cmpi eq, %arg0, %c1_i32 : i32
    %56 = arith.extui %55 : i1 to i32
    %c0_i32_35 = arith.constant 0 : i32
    %57 = arith.cmpi ne, %56, %c0_i32_35 : i32
    scf.if %57 {
      %c0_36 = arith.constant 0 : index
      %c0_37 = arith.constant 0 : index
      %58 = vector.load %arg4[%c0_36, %c0_37] : memref<8x128xf32, #tpu.memory_space<vmem>>, vector<8x128xf32>
      %59 = tpu.iota {dimensions = array<i32: 0>} : vector<128x128xi32>
      %60 = tpu.iota {dimensions = array<i32: 1>} : vector<128x128xi32>
      %c4_i32 = arith.constant 4 : i32
      %c0_i32_38 = arith.constant 0 : i32
      %61 = arith.cmpi eq, %c4_i32, %c0_i32_38 : i32
      %c1_i32_39 = arith.constant 1 : i32
      %62 = arith.select %61, %c1_i32_39, %c4_i32 : i32
      %63 = vector.broadcast %62 : i32 to vector<128x128xi32>
      %64 = arith.remsi %59, %63 : vector<128x128xi32>
      %c0_i32_40 = arith.constant 0 : i32
      %65 = vector.broadcast %c0_i32_40 : i32 to vector<128x128xi32>
      %66 = arith.cmpi ne, %64, %65 : vector<128x128xi32>
      %c0_i32_41 = arith.constant 0 : i32
      %67 = vector.broadcast %c0_i32_41 : i32 to vector<128x128xi32>
      %68 = arith.cmpi slt, %64, %67 : vector<128x128xi32>
      %c0_i32_42 = arith.constant 0 : i32
      %69 = arith.cmpi slt, %62, %c0_i32_42 : i32
      %70 = vector.broadcast %69 : i1 to vector<128x128xi1>
      %71 = vector.broadcast %70 : vector<128x128xi1> to vector<128x128xi1>
      %72 = arith.xori %68, %71 : vector<128x128xi1>
      %73 = arith.andi %72, %66 : vector<128x128xi1>
      %74 = vector.broadcast %62 : i32 to vector<128x128xi32>
      %75 = arith.addi %64, %74 : vector<128x128xi32>
      %76 = arith.select %73, %75, %64 : vector<128x128xi1>, vector<128x128xi32>
      %77 = arith.cmpi eq, %76, %60 : vector<128x128xi32>
      %c4_i32_43 = arith.constant 4 : i32
      %78 = vector.broadcast %c4_i32_43 : i32 to vector<128x128xi32>
      %79 = arith.cmpi slt, %60, %78 : vector<128x128xi32>
      %80 = arith.andi %77, %79 : vector<128x128xi1>
      %cst_44 = arith.constant 1.000000e+00 : f32
      %cst_45 = arith.constant 0.000000e+00 : f32
      %81 = vector.broadcast %cst_44 : f32 to vector<128x128xf32>
      %82 = vector.broadcast %cst_45 : f32 to vector<128x128xf32>
      %83 = arith.select %80, %81, %82 : vector<128x128xi1>, vector<128x128xf32>
      %cst_46 = arith.constant dense<0.000000e+00> : vector<8x128xf32>
      %84 = tpu.matmul %58, %83, %cst_46 {dimension_numbers = #tpu.dot_dimension_numbers<[1], [0], [0], [1], [0, 0, 1, 1], [], []>} : vector<8x128xf32>, vector<128x128xf32>, vector<8x128xf32> -> vector<8x128xf32>
      %85 = vector.extract_strided_slice %84 {offsets = [0, 0], sizes = [1, 128], strides = [1, 1]} : vector<8x128xf32> to vector<1x128xf32>
      %86 = vector.extract_strided_slice %84 {offsets = [1, 0], sizes = [1, 128], strides = [1, 1]} : vector<8x128xf32> to vector<1x128xf32>
      %87 = vector.extract_strided_slice %84 {offsets = [2, 0], sizes = [1, 128], strides = [1, 1]} : vector<8x128xf32> to vector<1x128xf32>
      %88 = vector.extract_strided_slice %84 {offsets = [3, 0], sizes = [1, 128], strides = [1, 1]} : vector<8x128xf32> to vector<1x128xf32>
      %89 = vector.extract_strided_slice %84 {offsets = [4, 0], sizes = [1, 128], strides = [1, 1]} : vector<8x128xf32> to vector<1x128xf32>
      %90 = vector.extract_strided_slice %84 {offsets = [5, 0], sizes = [1, 128], strides = [1, 1]} : vector<8x128xf32> to vector<1x128xf32>
      %91 = vector.extract_strided_slice %84 {offsets = [6, 0], sizes = [1, 128], strides = [1, 1]} : vector<8x128xf32> to vector<1x128xf32>
      %92 = vector.extract_strided_slice %84 {offsets = [7, 0], sizes = [1, 128], strides = [1, 1]} : vector<8x128xf32> to vector<1x128xf32>
      %cst_47 = arith.constant 1.562500e-02 : f32
      %93 = vector.broadcast %cst_47 : f32 to vector<1x128xf32>
      %94 = arith.mulf %85, %93 : vector<1x128xf32>
      %cst_48 = arith.constant 1.562500e-02 : f32
      %95 = vector.broadcast %cst_48 : f32 to vector<1x128xf32>
      %96 = arith.mulf %86, %95 : vector<1x128xf32>
      %cst_49 = arith.constant 6.400000e+01 : f32
      %97 = vector.broadcast %cst_49 : f32 to vector<1x128xf32>
      %98 = arith.mulf %97, %94 : vector<1x128xf32>
      %99 = arith.mulf %98, %94 : vector<1x128xf32>
      %100 = arith.subf %90, %99 : vector<1x128xf32>
      %cst_50 = arith.constant 1.024000e+03 : f32
      %101 = vector.broadcast %cst_50 : f32 to vector<1x128xf32>
      %102 = arith.mulf %101, %100 : vector<1x128xf32>
      %103 = arith.addf %87, %102 : vector<1x128xf32>
      %cst_51 = arith.constant 6.400000e+01 : f32
      %104 = vector.broadcast %cst_51 : f32 to vector<1x128xf32>
      %105 = arith.mulf %104, %96 : vector<1x128xf32>
      %106 = arith.mulf %105, %96 : vector<1x128xf32>
      %107 = arith.subf %91, %106 : vector<1x128xf32>
      %cst_52 = arith.constant 1.024000e+03 : f32
      %108 = vector.broadcast %cst_52 : f32 to vector<1x128xf32>
      %109 = arith.mulf %108, %107 : vector<1x128xf32>
      %110 = arith.addf %88, %109 : vector<1x128xf32>
      %cst_53 = arith.constant 6.400000e+01 : f32
      %111 = vector.broadcast %cst_53 : f32 to vector<1x128xf32>
      %112 = arith.mulf %111, %94 : vector<1x128xf32>
      %113 = arith.mulf %112, %96 : vector<1x128xf32>
      %114 = arith.subf %92, %113 : vector<1x128xf32>
      %cst_54 = arith.constant 1.024000e+03 : f32
      %115 = vector.broadcast %cst_54 : f32 to vector<1x128xf32>
      %116 = arith.mulf %115, %114 : vector<1x128xf32>
      %117 = arith.addf %89, %116 : vector<1x128xf32>
      %cst_55 = arith.constant 1.52587891E-5 : f32
      %118 = vector.broadcast %cst_55 : f32 to vector<1x128xf32>
      %119 = arith.mulf %103, %118 : vector<1x128xf32>
      %cst_56 = arith.constant 1.52587891E-5 : f32
      %120 = vector.broadcast %cst_56 : f32 to vector<1x128xf32>
      %121 = arith.mulf %110, %120 : vector<1x128xf32>
      %cst_57 = arith.constant 1.52587891E-5 : f32
      %122 = vector.broadcast %cst_57 : f32 to vector<1x128xf32>
      %123 = arith.mulf %117, %122 : vector<1x128xf32>
      %cst_58 = arith.constant 9.99999993E-9 : f32
      %124 = vector.broadcast %cst_58 : f32 to vector<1x128xf32>
      %125 = arith.addf %119, %124 : vector<1x128xf32>
      %126 = math.rsqrt %125 : vector<1x128xf32>
      %127 = arith.mulf %123, %126 : vector<1x128xf32>
      %cst_59 = arith.constant 9.99999993E-9 : f32
      %128 = vector.broadcast %cst_59 : f32 to vector<1x128xf32>
      %129 = arith.addf %121, %128 : vector<1x128xf32>
      %130 = math.rsqrt %129 : vector<1x128xf32>
      %131 = arith.mulf %127, %130 : vector<1x128xf32>
      %cst_60 = arith.constant dense<0.000000e+00> : vector<1xf32>
      %132 = vector.multi_reduction <add>, %131, %cst_60 [1] : vector<1x128xf32> to vector<1xf32>
      %133 = vector.shape_cast %132 : vector<1xf32> to vector<1x1xf32>
      %cst_61 = arith.constant -2.500000e-01 : f32
      %134 = vector.broadcast %cst_61 : f32 to vector<1x1xf32>
      %135 = arith.mulf %133, %134 : vector<1x1xf32>
      %c0_62 = arith.constant 0 : index
      %c0_63 = arith.constant 0 : index
      %136 = vector.load %arg3[%c0_62, %c0_63] : memref<1x1xf32, #tpu.memory_space<vmem>>, vector<1x1xf32>
      tpu.vector_store %arg3[%c0_62, %c0_63], %135 {strides = array<i32>} : memref<1x1xf32, #tpu.memory_space<vmem>>, vector<1x1xf32>,
    } else {
    }
    return
  }
  func.func @transform_0(%arg0: i32) -> (i32, i32) {
    %c0_i32 = arith.constant 0 : i32
    %c0_i32_0 = arith.constant 0 : i32
    return %arg0, %c0_i32 : i32, i32
  }
  func.func @transform_1(%arg0: i32) -> (i32, i32) {
    %c0_i32 = arith.constant 0 : i32
    %c0_i32_0 = arith.constant 0 : i32
    return %arg0, %c0_i32 : i32, i32
  }
  func.func @transform_2(%arg0: i32) -> (i32, i32) {
    %c0_i32 = arith.constant 0 : i32
    %c0_i32_0 = arith.constant 0 : i32
    %c0_i32_1 = arith.constant 0 : i32
    return %c0_i32, %c0_i32_0 : i32, i32
  }
}

</mosaic_0001>

<bundles_post_ra>
// kernel: npcc_loss.1
= control target key start
LH: loop header
LB: loop body
LE: loop exit
PB: predicated region body
PF: predicated region fallthrough
CT: control target
= control target key end

     0   :  { %7 = vsyncpa [#allocation4], 0  ;;  %s2313_s9 = smov 0   ;;  %s3736_s0 = inlined_call_operand.vmem [shape: f32[2048,128], index: 0, kind: input, shape index: {}]   ;;  %s3737_s1 = inlined_call_operand.vmem [shape: f32[2048,128], index: 1, kind: input, shape index: {}]   ;;  %s3738_s2 = inlined_call_operand.hbm [shape: f32[1,1], index: 2, kind: output, shape index: {}]  }
   0x1 LB: > { %s2319_s10 = sadd.s32 4294967295, %s2290_s9   ;;  %p1938_p0 = scmp.ge.s32.totalorder %s2290_s9, 1  ;;  %s2290_s9 = sphi %s2313_s9, %s13_s9  }
   0x2   : > { %p120_p1 = scmp.lt.s32.totalorder %s2290_s9, 3 }
   0x4   : > { %p121_p2 = pnand %p1938_p0, %p120_p1 }
   0x6   : > { %124 = sbr.rel (%p121_p2) target bundleno = 902 (0x386), region = 28 }
   0xd   : > { %s1939_s11 = sshll.u32 %s2319_s10, 7  ;;  %p1943_p4 = scmp.ne.s32.totalorder %s2319_s10, 0 }
   0xe   : > { %p143_p3 = scmp.lt.s32.totalorder %s1939_s11, 255  ;;  %v2292_v0 = vmov (!%p1943_p4), 0.0  }
   0xf   : > { %157 = sbr.rel (%p1943_p4) target bundleno = 22 (0x16), region = 32  ;;  %158 = vst [vmem:[#allocation2] sm:$0xff] (!%p1943_p4), %v2292_v0 }
  0x10   : > { %s3837_s11 = smov (!%p143_p3, %s1939_s11), 255 }
  0x11   : > { %s1940_s12 = sshll.u32 %s3837_s11, 3 }
  0x12   : > { %s2327_s15 = scalar_lea.vmem %s3736_s0, %s1940_s12  ;;  %s2332_s18 = scalar_lea.vmem %s3737_s1, %s1940_s12 }
  0x16 PF: > { %v2336_v1 = vld [vmem:[%s2327_s15] sm:$0xff]  ;;  %v160_v2 = vld [vmem:[%s2327_s15 + $0x8] sm:$0xff]  ;;  %v161_v3 = vld [vmem:[%s2327_s15 + $0x10] sm:$0xff]  ;;  %p1944_p5 = scmp.ne.s32.totalorder %s2319_s10, 1 }
  0x17   : > { %v415_v4 = vadd.f32 %v160_v2, %v2336_v1  ;;  %v681_v5 = vmul.f32 %v2336_v1, %v2336_v1  ;;  %v682_v6 = vmul.f32 %v160_v2, %v160_v2  ;;  %v162_v7 = vld [vmem:[%s2327_s15 + $0x18] sm:$0xff]  ;;  %v683_v8 = vmul.f32 %v161_v3, %v161_v3  ;;  %v163_v10 = vld [vmem:[%s2327_s15 + $0x20] sm:$0xff]  ;;  %v164_v14 = vld [vmem:[%s2327_s15 + $0x28] sm:$0xff] }
  0x18   : > { %v684_v11 = vmul.f32 %v162_v7, %v162_v7  ;;  %v685_v15 = vmul.f32 %v163_v10, %v163_v10  ;;  %v165_v18 = vld [vmem:[%s2327_s15 + $0x30] sm:$0xff]  ;;  %v686_v19 = vmul.f32 %v164_v14, %v164_v14  ;;  %v166_v22 = vld [vmem:[%s2327_s15 + $0x38] sm:$0xff]  ;;  %v167_v26 = vld [vmem:[%s2327_s15 + $0x40] sm:$0xff]  ;;  %vm2294_vm0 = vmmov (!%p1944_p5), 0  }
  0x19   : > { %v416_v9 = vadd.f32 %v415_v4, %v161_v3  ;;  %v809_v12 = vadd.f32 %v682_v6, %v681_v5  ;;  %v687_v23 = vmul.f32 %v165_v18, %v165_v18  ;;  %v688_v27 = vmul.f32 %v166_v22, %v166_v22  ;;  %v168_v30 = vld [vmem:[%s2327_s15 + $0x48] sm:$0xff]  ;;  %v169_v34 = vld [vmem:[%s2327_s15 + $0x50] sm:$0xff]  ;;  %v170_v38 = vld [vmem:[%s2327_s15 + $0x58] sm:$0xff] }
  0x1a   : > { %v689_v31 = vmul.f32 %v167_v26, %v167_v26  ;;  %v690_v35 = vmul.f32 %v168_v30, %v168_v30  ;;  %v691_v39 = vmul.f32 %v169_v34, %v169_v34  ;;  %v171_v42 = vld [vmem:[%s2327_s15 + $0x60] sm:$0xff]  ;;  %v692_v43 = vmul.f32 %v170_v38, %v170_v38  ;;  %v172_v46 = vld [vmem:[%s2327_s15 + $0x68] sm:$0xff]  ;;  %v173_v50 = vld [vmem:[%s2327_s15 + $0x70] sm:$0xff] }
  0x1b   : > { %v417_v13 = vadd.f32 %v416_v9, %v162_v7  ;;  %v810_v16 = vadd.f32 %v809_v12, %v683_v8  ;;  %v693_v47 = vmul.f32 %v171_v42, %v171_v42  ;;  %v694_v51 = vmul.f32 %v172_v46, %v172_v46  ;;  %v174_v54 = vld [vmem:[%s2327_s15 + $0x78] sm:$0xff]  ;;  %v175_v58 = vld [vmem:[%s2327_s15 + $0x80] sm:$0xff]  ;;  %v176_v62 = vld [vmem:[%s2327_s15 + $0x88] sm:$0xff] }
  0x1c   : > { %v695_v55 = vmul.f32 %v173_v50, %v173_v50  ;;  %v696_v59 = vmul.f32 %v174_v54, %v174_v54  ;;  %v697_v63 = vmul.f32 %v175_v58, %v175_v58  ;;  %v177_v3 = vld [vmem:[%s2327_s15 + $0x90] sm:$0xff]  ;;  %v698_v4 = vmul.f32 %v176_v62, %v176_v62  ;;  %v178_v7 = vld [vmem:[%s2327_s15 + $0x98] sm:$0xff] }
  0x1d   : > { %v418_v17 = vadd.f32 %v417_v13, %v163_v10  ;;  %v811_v20 = vadd.f32 %v810_v16, %v684_v11  ;;  %v699_v8 = vmul.f32 %v177_v3, %v177_v3  ;;  %v179_v11 = vld [vmem:[%s2327_s15 + $0xa0] sm:$0xff]  ;;  %v700_v12 = vmul.f32 %v178_v7, %v178_v7 }
  0x1e   : > { %v701_v16 = vmul.f32 %v179_v11, %v179_v11 }
  0x1f   : > { %v419_v21 = vadd.f32 %v418_v17, %v164_v14  ;;  %v812_v24 = vadd.f32 %v811_v20, %v685_v15  ;;  %v180_v15 = vld [vmem:[%s2327_s15 + $0xa8] sm:$0xff] }
  0x20   : > { %v702_v20 = vmul.f32 %v180_v15, %v180_v15 }
  0x21   : > { %v420_v25 = vadd.f32 %v419_v21, %v165_v18  ;;  %v813_v28 = vadd.f32 %v812_v24, %v686_v19  ;;  %v181_v19 = vld [vmem:[%s2327_s15 + $0xb0] sm:$0xff]  ;;  %v2365_v24 = vld [vmem:[%s2332_s18] sm:$0xff] }
  0x23   : > { %v421_v29 = vadd.f32 %v420_v25, %v166_v22  ;;  %v814_v32 = vadd.f32 %v813_v28, %v687_v23  ;;  %v182_v23 = vld [vmem:[%s2327_s15 + $0xb8] sm:$0xff]  ;;  %v703_v25 = vmul.f32 %v181_v19, %v181_v19  ;;  %v2371_v28 = vld [vmem:[%s2332_s18 + $0x10] sm:$0xff] }
  0x25   : > { %v422_v33 = vadd.f32 %v421_v29, %v167_v26  ;;  %v815_v36 = vadd.f32 %v814_v32, %v688_v27  ;;  %v2368_v27 = vld [vmem:[%s2332_s18 + $0x8] sm:$0xff] }
  0x26   : > { %v548_v32 = vadd.f32 %v2368_v27, %v2365_v24 }
  0x27   : > { %v423_v37 = vadd.f32 %v422_v33, %v168_v30  ;;  %v816_v40 = vadd.f32 %v815_v36, %v689_v31  ;;  %v2375_v30 = vmul.f32 %v2365_v24, %v2336_v1  ;;  %v183_v31 = vld [vmem:[%s2327_s15 + $0xc0] sm:$0xff]  ;;  %v704_v33 = vmul.f32 %v182_v23, %v182_v23 }
  0x28   : > { %v2386_v1 = vld [vmem:[%s2332_s18 + $0x20] sm:$0xff] }
  0x29   : > { %v424_v41 = vadd.f32 %v423_v37, %v169_v34  ;;  %v817_v44 = vadd.f32 %v816_v40, %v690_v35  ;;  %v2381_v35 = vld [vmem:[%s2332_s18 + $0x18] sm:$0xff]  ;;  %v184_v37 = vld [vmem:[%s2327_s15 + $0xc8] sm:$0xff] }
  0x2b   : > { %v425_v45 = vadd.f32 %v424_v41, %v170_v38  ;;  %v818_v48 = vadd.f32 %v817_v44, %v691_v39  ;;  %v549_v38 = vadd.f32 %v548_v32, %v2371_v28  ;;  %v705_v39 = vmul.f32 %v183_v31, %v183_v31 }
  0x2c   : > { %v706_v44 = vmul.f32 %v184_v37, %v184_v37 }
  0x2d   : > { %v426_v49 = vadd.f32 %v425_v45, %v171_v42  ;;  %v819_v52 = vadd.f32 %v818_v48, %v692_v43  ;;  %v185_v42 = vld [vmem:[%s2327_s15 + $0xd0] sm:$0xff]  ;;  %v550_v43 = vadd.f32 %v549_v38, %v2381_v35  ;;  %v186_v48 = vld [vmem:[%s2327_s15 + $0xd8] sm:$0xff] }
  0x2e   : > { %v194_v38 = vld [vmem:[%s2327_s15 + $0x118] sm:$0xff] }
  0x2f   : > { %v427_v53 = vadd.f32 %v426_v49, %v172_v46  ;;  %v820_v56 = vadd.f32 %v819_v52, %v693_v47  ;;  %v2391_v46 = vld [vmem:[%s2332_s18 + $0x28] sm:$0xff]  ;;  %v551_v49 = vadd.f32 %v550_v43, %v2386_v1  ;;  %v2396_v52 = vld [vmem:[%s2332_s18 + $0x30] sm:$0xff] }
  0x31   : > { %v428_v57 = vadd.f32 %v427_v53, %v173_v50  ;;  %v821_v60 = vadd.f32 %v820_v56, %v694_v51  ;;  %v707_v50 = vmul.f32 %v185_v42, %v185_v42  ;;  %v708_v56 = vmul.f32 %v186_v48, %v186_v48 }
  0x33   : > { %v429_v61 = vadd.f32 %v428_v57, %v174_v54  ;;  %v822_v0 = vadd.f32 %v821_v60, %v695_v55  ;;  %v187_v54 = vld [vmem:[%s2327_s15 + $0xe0] sm:$0xff]  ;;  %v552_v55 = vadd.f32 %v551_v49, %v2391_v46  ;;  %v188_v60 = vld [vmem:[%s2327_s15 + $0xe8] sm:$0xff]  ;;  %v2441_v49 = vld [vmem:[%s2332_s18 + $0x78] sm:$0xff] }
  0x35   : > { %v430_v2 = vadd.f32 %v429_v61, %v175_v58  ;;  %v823_v5 = vadd.f32 %v822_v0, %v696_v59  ;;  %v2401_v58 = vld [vmem:[%s2332_s18 + $0x38] sm:$0xff]  ;;  %v553_v61 = vadd.f32 %v552_v55, %v2396_v52  ;;  %v2406_v0 = vld [vmem:[%s2332_s18 + $0x40] sm:$0xff] }
  0x37   : > { %v431_v6 = vadd.f32 %v430_v2, %v176_v62  ;;  %v824_v9 = vadd.f32 %v823_v5, %v697_v63  ;;  %v709_v62 = vmul.f32 %v187_v54, %v187_v54  ;;  %v710_v5 = vmul.f32 %v188_v60, %v188_v60 }
  0x39   : > { %v432_v10 = vadd.f32 %v431_v6, %v177_v3  ;;  %v825_v13 = vadd.f32 %v824_v9, %v698_v4  ;;  %v189_v3 = vld [vmem:[%s2327_s15 + $0xf0] sm:$0xff]  ;;  %v554_v4 = vadd.f32 %v553_v61, %v2401_v58  ;;  %v190_v9 = vld [vmem:[%s2327_s15 + $0xf8] sm:$0xff] }
  0x3b   : > { %v433_v14 = vadd.f32 %v432_v10, %v178_v7  ;;  %v826_v17 = vadd.f32 %v825_v13, %v699_v8  ;;  %v2411_v7 = vld [vmem:[%s2332_s18 + $0x48] sm:$0xff]  ;;  %v555_v10 = vadd.f32 %v554_v4, %v2406_v0  ;;  %v2416_v13 = vld [vmem:[%s2332_s18 + $0x50] sm:$0xff] }
  0x3d   : > { %v434_v18 = vadd.f32 %v433_v14, %v179_v11  ;;  %v827_v21 = vadd.f32 %v826_v17, %v700_v12  ;;  %v711_v11 = vmul.f32 %v189_v3, %v189_v3  ;;  %v712_v17 = vmul.f32 %v190_v9, %v190_v9 }
  0x3f   : > { %v435_v22 = vadd.f32 %v434_v18, %v180_v15  ;;  %v828_v26 = vadd.f32 %v827_v21, %v701_v16  ;;  %v191_v15 = vld [vmem:[%s2327_s15 + $0x100] sm:$0xff]  ;;  %v556_v16 = vadd.f32 %v555_v10, %v2411_v7  ;;  %v192_v21 = vld [vmem:[%s2327_s15 + $0x108] sm:$0xff] }
  0x40   : > { %v199_v10 = vld [vmem:[%s2327_s15 + $0x140] sm:$0xff] }
  0x41   : > { %v436_v29 = vadd.f32 %v435_v22, %v181_v19  ;;  %v829_v34 = vadd.f32 %v828_v26, %v702_v20  ;;  %v2421_v19 = vld [vmem:[%s2332_s18 + $0x58] sm:$0xff]  ;;  %v557_v22 = vadd.f32 %v556_v16, %v2416_v13  ;;  %v2426_v26 = vld [vmem:[%s2332_s18 + $0x60] sm:$0xff] }
  0x43   : > { %v437_v36 = vadd.f32 %v436_v29, %v182_v23  ;;  %v830_v40 = vadd.f32 %v829_v34, %v703_v25  ;;  %v713_v23 = vmul.f32 %v191_v15, %v191_v15  ;;  %v558_v32 = vadd.f32 %v557_v22, %v2421_v19  ;;  %v2466_v22 = vld [vmem:[%s2332_s18 + $0xa0] sm:$0xff] }
  0x45   : > { %v438_v41 = vadd.f32 %v437_v36, %v183_v31  ;;  %v831_v45 = vadd.f32 %v830_v40, %v704_v33  ;;  %v193_v31 = vld [vmem:[%s2327_s15 + $0x110] sm:$0xff]  ;;  %v714_v33 = vmul.f32 %v192_v21, %v192_v21  ;;  %v2431_v36 = vld [vmem:[%s2332_s18 + $0x68] sm:$0xff] }
  0x46   : > { %v715_v40 = vmul.f32 %v193_v31, %v193_v31 }
  0x47   : > { %v439_v47 = vadd.f32 %v438_v41, %v184_v37  ;;  %v832_v51 = vadd.f32 %v831_v45, %v705_v39  ;;  %v559_v39 = vadd.f32 %v558_v32, %v2426_v26 }
  0x49   : > { %v440_v53 = vadd.f32 %v439_v47, %v185_v42  ;;  %v833_v57 = vadd.f32 %v832_v51, %v706_v44  ;;  %v2436_v42 = vld [vmem:[%s2332_s18 + $0x70] sm:$0xff]  ;;  %v195_v44 = vld [vmem:[%s2327_s15 + $0x120] sm:$0xff]  ;;  %v560_v45 = vadd.f32 %v559_v39, %v2431_v36  ;;  %v716_v47 = vmul.f32 %v194_v38, %v194_v38  ;;  %v196_v51 = vld [vmem:[%s2327_s15 + $0x128] sm:$0xff] }
  0x4a   : > { %v718_v61 = vmul.f32 %v196_v51, %v196_v51 }
  0x4b   : > { %v441_v59 = vadd.f32 %v440_v53, %v186_v48  ;;  %v834_v63 = vadd.f32 %v833_v57, %v707_v50  ;;  %v561_v53 = vadd.f32 %v560_v45, %v2436_v42  ;;  %v943_v45 = vmul.f32 %v2368_v27, %v2368_v27  ;;  %v2492_v27 = vld [vmem:[%s2332_s18 + $0xc0] sm:$0xff] }
  0x4d   : > { %v442_v2 = vadd.f32 %v441_v59, %v187_v54  ;;  %v835_v6 = vadd.f32 %v834_v63, %v708_v56  ;;  %v717_v54 = vmul.f32 %v195_v44, %v195_v44  ;;  %v2446_v56 = vld [vmem:[%s2332_s18 + $0x80] sm:$0xff]  ;;  %v197_v59 = vld [vmem:[%s2327_s15 + $0x130] sm:$0xff]  ;;  %v2451_v63 = vld [vmem:[%s2332_s18 + $0x88] sm:$0xff] }
  0x4f   : > { %v443_v8 = vadd.f32 %v442_v2, %v188_v60  ;;  %v836_v12 = vadd.f32 %v835_v6, %v709_v62  ;;  %v562_v60 = vadd.f32 %v561_v53, %v2441_v49  ;;  %v2485_v53 = vld [vmem:[%s2332_s18 + $0xb8] sm:$0xff] }
  0x51   : > { %v444_v14 = vadd.f32 %v443_v8, %v189_v3  ;;  %v837_v18 = vadd.f32 %v836_v12, %v710_v5  ;;  %v198_v3 = vld [vmem:[%s2327_s15 + $0x138] sm:$0xff]  ;;  %v563_v4 = vadd.f32 %v562_v60, %v2446_v56  ;;  %v719_v5 = vmul.f32 %v197_v59, %v197_v59  ;;  %v2456_v8 = vld [vmem:[%s2332_s18 + $0x90] sm:$0xff] }
  0x52   : > { %v720_v12 = vmul.f32 %v198_v3, %v198_v3 }
  0x53   : > { %v445_v20 = vadd.f32 %v444_v14, %v190_v9  ;;  %v838_v25 = vadd.f32 %v837_v18, %v711_v11  ;;  %v564_v11 = vadd.f32 %v563_v4, %v2451_v63 }
  0x55   : > { %v446_v29 = vadd.f32 %v445_v20, %v191_v15  ;;  %v839_v34 = vadd.f32 %v838_v25, %v712_v17  ;;  %v2461_v15 = vld [vmem:[%s2332_s18 + $0x98] sm:$0xff]  ;;  %v200_v17 = vld [vmem:[%s2327_s15 + $0x148] sm:$0xff]  ;;  %v565_v18 = vadd.f32 %v564_v11, %v2456_v8  ;;  %v721_v20 = vmul.f32 %v199_v10, %v199_v10  ;;  %v201_v25 = vld [vmem:[%s2327_s15 + $0x150] sm:$0xff] }
  0x56   : > { %v723_v39 = vmul.f32 %v201_v25, %v201_v25 }
  0x57   : > { %v447_v37 = vadd.f32 %v446_v29, %v192_v21  ;;  %v840_v41 = vadd.f32 %v839_v34, %v713_v23  ;;  %v566_v29 = vadd.f32 %v565_v18, %v2461_v15 }
  0x59   : > { %v448_v43 = vadd.f32 %v447_v37, %v193_v31  ;;  %v841_v48 = vadd.f32 %v840_v41, %v714_v33  ;;  %v722_v31 = vmul.f32 %v200_v17, %v200_v17  ;;  %v2471_v33 = vld [vmem:[%s2332_s18 + $0xa8] sm:$0xff]  ;;  %v202_v37 = vld [vmem:[%s2327_s15 + $0x158] sm:$0xff]  ;;  %v2476_v41 = vld [vmem:[%s2332_s18 + $0xb0] sm:$0xff] }
  0x5b   : > { %v449_v50 = vadd.f32 %v448_v43, %v194_v38  ;;  %v842_v55 = vadd.f32 %v841_v48, %v715_v40  ;;  %v567_v38 = vadd.f32 %v566_v29, %v2466_v22 }
  0x5d   : > { %v450_v57 = vadd.f32 %v449_v50, %v195_v44  ;;  %v843_v62 = vadd.f32 %v842_v55, %v716_v47  ;;  %v942_v44 = vmul.f32 %v2365_v24, %v2365_v24  ;;  %v203_v47 = vld [vmem:[%s2327_s15 + $0x160] sm:$0xff]  ;;  %v568_v48 = vadd.f32 %v567_v38, %v2471_v33  ;;  %v208_v38 = vld [vmem:[%s2327_s15 + $0x188] sm:$0xff] }
  0x5e   : > { %v724_v50 = vmul.f32 %v202_v37, %v202_v37  ;;  %v944_v55 = vmul.f32 %v2371_v28, %v2371_v28 }
  0x5f   : > { %v451_v2 = vadd.f32 %v450_v57, %v196_v51  ;;  %v844_v6 = vadd.f32 %v843_v62, %v717_v54  ;;  %v204_v57 = vld [vmem:[%s2327_s15 + $0x168] sm:$0xff]  ;;  %v569_v24 = vadd.f32 %v568_v48, %v2476_v41  ;;  %v945_v62 = vmul.f32 %v2381_v35, %v2381_v35  ;;  %v209_v48 = vld [vmem:[%s2327_s15 + $0x190] sm:$0xff] }
  0x61   : > { %v452_v9 = vadd.f32 %v451_v2, %v197_v59  ;;  %v845_v14 = vadd.f32 %v844_v6, %v718_v61  ;;  %v725_v59 = vmul.f32 %v203_v47, %v203_v47  ;;  %v1070_v2 = vadd.f32 %v943_v45, %v942_v44  ;;  %v2499_v6 = vld [vmem:[%s2332_s18 + $0xc8] sm:$0xff] }
  0x62   : > { %v570_v4 = vadd.f32 %v569_v24, %v2485_v53  ;;  %v949_v45 = vmul.f32 %v2401_v58, %v2401_v58  ;;  %v731_v58 = vmul.f32 %v209_v48, %v209_v48 }
  0x63   : > { %v453_v16 = vadd.f32 %v452_v9, %v198_v3  ;;  %v846_v21 = vadd.f32 %v845_v14, %v719_v5  ;;  %v205_v3 = vld [vmem:[%s2327_s15 + $0x170] sm:$0xff]  ;;  %v726_v5 = vmul.f32 %v204_v57, %v204_v57  ;;  %v1071_v11 = vadd.f32 %v1070_v2, %v944_v55 }
  0x64   : > { %v571_v14 = vadd.f32 %v570_v4, %v2492_v27  ;;  %v727_v35 = vmul.f32 %v205_v3, %v205_v3 }
  0x65   : > { %v454_v23 = vadd.f32 %v453_v16, %v199_v10  ;;  %v847_v32 = vadd.f32 %v846_v21, %v720_v12  ;;  %v946_v10 = vmul.f32 %v2386_v1, %v2386_v1  ;;  %v206_v12 = vld [vmem:[%s2327_s15 + $0x178] sm:$0xff]  ;;  %v1072_v21 = vadd.f32 %v1071_v11, %v945_v62  ;;  %v2534_v62 = vld [vmem:[%s2332_s18 + $0xf0] sm:$0xff] }
  0x66   : > { %v728_v1 = vmul.f32 %v206_v12, %v206_v12 }
  0x67   : > { %v455_v34 = vadd.f32 %v454_v23, %v200_v17  ;;  %v848_v40 = vadd.f32 %v847_v32, %v721_v20  ;;  %v2506_v17 = vld [vmem:[%s2332_s18 + $0xd0] sm:$0xff]  ;;  %v947_v20 = vmul.f32 %v2391_v46, %v2391_v46  ;;  %v207_v23 = vld [vmem:[%s2327_s15 + $0x180] sm:$0xff] }
  0x68   : > { %v729_v46 = vmul.f32 %v207_v23, %v207_v23 }
  0x69   : > { %v456_v43 = vadd.f32 %v455_v34, %v201_v25  ;;  %v849_v51 = vadd.f32 %v848_v40, %v722_v31  ;;  %v572_v25 = vadd.f32 %v571_v14, %v2499_v6  ;;  %v2513_v31 = vld [vmem:[%s2332_s18 + $0xd8] sm:$0xff]  ;;  %v948_v34 = vmul.f32 %v2396_v52, %v2396_v52 }
  0x6a   : > { %v730_v52 = vmul.f32 %v208_v38, %v208_v38 }
  0x6b   : > { %v457_v54 = vadd.f32 %v456_v43, %v202_v37  ;;  %v850_v60 = vadd.f32 %v849_v51, %v723_v39  ;;  %v1073_v37 = vadd.f32 %v1072_v21, %v946_v10  ;;  %v573_v39 = vadd.f32 %v572_v25, %v2506_v17  ;;  %v2520_v43 = vld [vmem:[%s2332_s18 + $0xe0] sm:$0xff]  ;;  %v2541_v10 = vld [vmem:[%s2332_s18 + $0xf8] sm:$0xff] }
  0x6d   : > { %v458_v61 = vadd.f32 %v457_v54, %v203_v47  ;;  %v851_v28 = vadd.f32 %v850_v60, %v724_v50  ;;  %v1074_v47 = vadd.f32 %v1073_v37, %v947_v20  ;;  %v574_v50 = vadd.f32 %v573_v39, %v2513_v31  ;;  %v2527_v54 = vld [vmem:[%s2332_s18 + $0xe8] sm:$0xff]  ;;  %v2548_v20 = vld [vmem:[%s2332_s18 + $0x100] sm:$0xff] }
  0x6f   : > { %v459_v9 = vadd.f32 %v458_v61, %v204_v57  ;;  %v852_v16 = vadd.f32 %v851_v28, %v725_v59  ;;  %v950_v57 = vmul.f32 %v2406_v0, %v2406_v0  ;;  %v1075_v24 = vadd.f32 %v1074_v47, %v948_v34  ;;  %v210_v59 = vld [vmem:[%s2327_s15 + $0x198] sm:$0xff]  ;;  %v2555_v34 = vld [vmem:[%s2332_s18 + $0x108] sm:$0xff] }
  0x70   : > { %v575_v60 = vadd.f32 %v574_v50, %v2520_v43  ;;  %v732_v0 = vmul.f32 %v210_v59, %v210_v59 }
  0x71   : > { %v460_v18 = vadd.f32 %v459_v9, %v205_v3  ;;  %v853_v29 = vadd.f32 %v852_v16, %v726_v5  ;;  %v951_v3 = vmul.f32 %v2411_v7, %v2411_v7  ;;  %v1076_v4 = vadd.f32 %v1075_v24, %v949_v45  ;;  %v211_v5 = vld [vmem:[%s2327_s15 + $0x1a0] sm:$0xff]  ;;  %v2562_v45 = vld [vmem:[%s2332_s18 + $0x110] sm:$0xff] }
  0x72   : > { %v576_v28 = vadd.f32 %v575_v60, %v2527_v54  ;;  %v733_v7 = vmul.f32 %v211_v5, %v211_v5 }
  0x73   : > { %v461_v32 = vadd.f32 %v460_v18, %v206_v12  ;;  %v854_v40 = vadd.f32 %v853_v29, %v727_v35  ;;  %v952_v12 = vmul.f32 %v2416_v13, %v2416_v13  ;;  %v1077_v14 = vadd.f32 %v1076_v4, %v950_v57  ;;  %v212_v35 = vld [vmem:[%s2327_s15 + $0x1a8] sm:$0xff]  ;;  %v2569_v57 = vld [vmem:[%s2332_s18 + $0x118] sm:$0xff] }
  0x74   : > { %v577_v16 = vadd.f32 %v576_v28, %v2534_v62  ;;  %v734_v13 = vmul.f32 %v212_v35, %v212_v35 }
  0x75   : > { %v462_v44 = vadd.f32 %v461_v32, %v207_v23  ;;  %v855_v51 = vadd.f32 %v854_v40, %v728_v1  ;;  %v953_v23 = vmul.f32 %v2421_v19, %v2421_v19  ;;  %v1078_v25 = vadd.f32 %v1077_v14, %v951_v3  ;;  %v213_v1 = vld [vmem:[%s2327_s15 + $0x1b0] sm:$0xff]  ;;  %v2576_v3 = vld [vmem:[%s2332_s18 + $0x120] sm:$0xff] }
  0x76   : > { %v578_v29 = vadd.f32 %v577_v16, %v2541_v10  ;;  %v735_v19 = vmul.f32 %v213_v1, %v213_v1 }
  0x77   : > { %v463_v55 = vadd.f32 %v462_v44, %v208_v38  ;;  %v856_v61 = vadd.f32 %v855_v51, %v729_v46  ;;  %v954_v38 = vmul.f32 %v2426_v26, %v2426_v26  ;;  %v1079_v39 = vadd.f32 %v1078_v25, %v952_v12  ;;  %v214_v46 = vld [vmem:[%s2327_s15 + $0x1b8] sm:$0xff]  ;;  %v2583_v12 = vld [vmem:[%s2332_s18 + $0x128] sm:$0xff] }
  0x78   : > { %v579_v40 = vadd.f32 %v578_v29, %v2548_v20  ;;  %v736_v26 = vmul.f32 %v214_v46, %v214_v46 }
  0x79   : > { %v464_v2 = vadd.f32 %v463_v55, %v209_v48  ;;  %v857_v9 = vadd.f32 %v856_v61, %v730_v52  ;;  %v955_v48 = vmul.f32 %v2431_v36, %v2431_v36  ;;  %v1080_v50 = vadd.f32 %v1079_v39, %v953_v23  ;;  %v215_v52 = vld [vmem:[%s2327_s15 + $0x1c0] sm:$0xff]  ;;  %v2590_v23 = vld [vmem:[%s2332_s18 + $0x130] sm:$0xff] }
  0x7a   : > { %v580_v51 = vadd.f32 %v579_v40, %v2555_v34  ;;  %v737_v36 = vmul.f32 %v215_v52, %v215_v52 }
  0x7b   : > { %v465_v11 = vadd.f32 %v464_v2, %v210_v59  ;;  %v858_v18 = vadd.f32 %v857_v9, %v731_v58  ;;  %v956_v59 = vmul.f32 %v2436_v42, %v2436_v42  ;;  %v1081_v60 = vadd.f32 %v1080_v50, %v954_v38  ;;  %v216_v58 = vld [vmem:[%s2327_s15 + $0x1c8] sm:$0xff]  ;;  %v2597_v38 = vld [vmem:[%s2332_s18 + $0x138] sm:$0xff] }
  0x7c   : > { %v581_v61 = vadd.f32 %v580_v51, %v2562_v45  ;;  %v738_v42 = vmul.f32 %v216_v58, %v216_v58 }
  0x7d   : > { %v466_v21 = vadd.f32 %v465_v11, %v211_v5  ;;  %v859_v32 = vadd.f32 %v858_v18, %v732_v0  ;;  %v957_v5 = vmul.f32 %v2441_v49, %v2441_v49  ;;  %v1082_v28 = vadd.f32 %v1081_v60, %v955_v48  ;;  %v217_v0 = vld [vmem:[%s2327_s15 + $0x1d0] sm:$0xff]  ;;  %v2604_v48 = vld [vmem:[%s2332_s18 + $0x140] sm:$0xff] }
  0x7e   : > { %v582_v9 = vadd.f32 %v581_v61, %v2569_v57  ;;  %v739_v49 = vmul.f32 %v217_v0, %v217_v0 }
  0x7f   : > { %v467_v37 = vadd.f32 %v466_v21, %v212_v35  ;;  %v860_v44 = vadd.f32 %v859_v32, %v733_v7  ;;  %v958_v35 = vmul.f32 %v2446_v56, %v2446_v56  ;;  %v1083_v16 = vadd.f32 %v1082_v28, %v956_v59  ;;  %v218_v7 = vld [vmem:[%s2327_s15 + $0x1d8] sm:$0xff]  ;;  %v2611_v59 = vld [vmem:[%s2332_s18 + $0x148] sm:$0xff] }
  0x80   : > { %v583_v18 = vadd.f32 %v582_v9, %v2576_v3  ;;  %v740_v56 = vmul.f32 %v218_v7, %v218_v7 }
  0x81   : > { %v468_v47 = vadd.f32 %v467_v37, %v213_v1  ;;  %v861_v55 = vadd.f32 %v860_v44, %v734_v13  ;;  %v959_v1 = vmul.f32 %v2451_v63, %v2451_v63  ;;  %v1084_v29 = vadd.f32 %v1083_v16, %v957_v5  ;;  %v219_v13 = vld [vmem:[%s2327_s15 + $0x1e0] sm:$0xff]  ;;  %v2618_v5 = vld [vmem:[%s2332_s18 + $0x150] sm:$0xff] }
  0x82   : > { %v584_v32 = vadd.f32 %v583_v18, %v2583_v12  ;;  %v741_v63 = vmul.f32 %v219_v13, %v219_v13 }
  0x83   : > { %v469_v24 = vadd.f32 %v468_v47, %v214_v46  ;;  %v862_v2 = vadd.f32 %v861_v55, %v735_v19  ;;  %v960_v46 = vmul.f32 %v2456_v8, %v2456_v8  ;;  %v1085_v40 = vadd.f32 %v1084_v29, %v958_v35  ;;  %v220_v19 = vld [vmem:[%s2327_s15 + $0x1e8] sm:$0xff]  ;;  %v2625_v35 = vld [vmem:[%s2332_s18 + $0x158] sm:$0xff] }
  0x84   : > { %v585_v44 = vadd.f32 %v584_v32, %v2590_v23  ;;  %v742_v8 = vmul.f32 %v220_v19, %v220_v19 }
  0x85   : > { %v470_v4 = vadd.f32 %v469_v24, %v215_v52  ;;  %v863_v11 = vadd.f32 %v862_v2, %v736_v26  ;;  %v961_v52 = vmul.f32 %v2461_v15, %v2461_v15  ;;  %v1086_v51 = vadd.f32 %v1085_v40, %v959_v1  ;;  %v221_v26 = vld [vmem:[%s2327_s15 + $0x1f0] sm:$0xff]  ;;  %v2632_v1 = vld [vmem:[%s2332_s18 + $0x160] sm:$0xff] }
  0x86   : > { %v586_v55 = vadd.f32 %v585_v44, %v2597_v38  ;;  %v743_v15 = vmul.f32 %v221_v26, %v221_v26 }
  0x87   : > { %v471_v14 = vadd.f32 %v470_v4, %v216_v58  ;;  %v864_v21 = vadd.f32 %v863_v11, %v737_v36  ;;  %v962_v58 = vmul.f32 %v2466_v22, %v2466_v22  ;;  %v1087_v61 = vadd.f32 %v1086_v51, %v960_v46  ;;  %v222_v36 = vld [vmem:[%s2327_s15 + $0x1f8] sm:$0xff]  ;;  %v2639_v46 = vld [vmem:[%s2332_s18 + $0x168] sm:$0xff] }
  0x88   : > { %v587_v2 = vadd.f32 %v586_v55, %v2604_v48  ;;  %v744_v22 = vmul.f32 %v222_v36, %v222_v36 }
  0x89   : > { %v472_v25 = vadd.f32 %v471_v14, %v217_v0  ;;  %v865_v37 = vadd.f32 %v864_v21, %v738_v42  ;;  %v963_v0 = vmul.f32 %v2471_v33, %v2471_v33  ;;  %v1088_v9 = vadd.f32 %v1087_v61, %v961_v52  ;;  %v223_v42 = vld [vmem:[%s2327_s15 + $0x200] sm:$0xff]  ;;  %v2646_v52 = vld [vmem:[%s2332_s18 + $0x170] sm:$0xff] }
  0x8a   : > { %v588_v11 = vadd.f32 %v587_v2, %v2611_v59  ;;  %v745_v33 = vmul.f32 %v223_v42, %v223_v42 }
  0x8b   : > { %v473_v39 = vadd.f32 %v472_v25, %v218_v7  ;;  %v866_v47 = vadd.f32 %v865_v37, %v739_v49  ;;  %v964_v7 = vmul.f32 %v2476_v41, %v2476_v41  ;;  %v1089_v18 = vadd.f32 %v1088_v9, %v962_v58  ;;  %v224_v49 = vld [vmem:[%s2327_s15 + $0x208] sm:$0xff]  ;;  %v2653_v58 = vld [vmem:[%s2332_s18 + $0x178] sm:$0xff] }
  0x8c   : > { %v589_v21 = vadd.f32 %v588_v11, %v2618_v5  ;;  %v746_v41 = vmul.f32 %v224_v49, %v224_v49 }
  0x8d   : > { %v474_v50 = vadd.f32 %v473_v39, %v219_v13  ;;  %v867_v24 = vadd.f32 %v866_v47, %v740_v56  ;;  %v965_v13 = vmul.f32 %v2485_v53, %v2485_v53  ;;  %v1090_v32 = vadd.f32 %v1089_v18, %v963_v0  ;;  %v225_v56 = vld [vmem:[%s2327_s15 + $0x210] sm:$0xff]  ;;  %v2660_v0 = vld [vmem:[%s2332_s18 + $0x180] sm:$0xff] }
  0x8e   : > { %v590_v37 = vadd.f32 %v589_v21, %v2625_v35  ;;  %v747_v53 = vmul.f32 %v225_v56, %v225_v56 }
  0x8f   : > { %v475_v60 = vadd.f32 %v474_v50, %v220_v19  ;;  %v868_v4 = vadd.f32 %v867_v24, %v741_v63  ;;  %v966_v19 = vmul.f32 %v2492_v27, %v2492_v27  ;;  %v1091_v44 = vadd.f32 %v1090_v32, %v964_v7  ;;  %v226_v63 = vld [vmem:[%s2327_s15 + $0x218] sm:$0xff]  ;;  %v2667_v7 = vld [vmem:[%s2332_s18 + $0x188] sm:$0xff] }
  0x90   : > { %v591_v47 = vadd.f32 %v590_v37, %v2632_v1  ;;  %v748_v27 = vmul.f32 %v226_v63, %v226_v63 }
  0x91   : > { %v476_v28 = vadd.f32 %v475_v60, %v221_v26  ;;  %v869_v14 = vadd.f32 %v868_v4, %v742_v8  ;;  %v967_v26 = vmul.f32 %v2499_v6, %v2499_v6  ;;  %v1092_v55 = vadd.f32 %v1091_v44, %v965_v13  ;;  %v227_v8 = vld [vmem:[%s2327_s15 + $0x220] sm:$0xff]  ;;  %v2674_v13 = vld [vmem:[%s2332_s18 + $0x190] sm:$0xff] }
  0x92   : > { %v592_v24 = vadd.f32 %v591_v47, %v2639_v46  ;;  %v749_v6 = vmul.f32 %v227_v8, %v227_v8 }
  0x93   : > { %v477_v16 = vadd.f32 %v476_v28, %v222_v36  ;;  %v870_v25 = vadd.f32 %v869_v14, %v743_v15  ;;  %v968_v36 = vmul.f32 %v2506_v17, %v2506_v17  ;;  %v1093_v2 = vadd.f32 %v1092_v55, %v966_v19  ;;  %v228_v15 = vld [vmem:[%s2327_s15 + $0x228] sm:$0xff]  ;;  %v2681_v19 = vld [vmem:[%s2332_s18 + $0x198] sm:$0xff] }
  0x94   : > { %v593_v4 = vadd.f32 %v592_v24, %v2646_v52  ;;  %v750_v17 = vmul.f32 %v228_v15, %v228_v15 }
  0x95   : > { %v478_v29 = vadd.f32 %v477_v16, %v223_v42  ;;  %v871_v39 = vadd.f32 %v870_v25, %v744_v22  ;;  %v969_v42 = vmul.f32 %v2513_v31, %v2513_v31  ;;  %v1094_v11 = vadd.f32 %v1093_v2, %v967_v26  ;;  %v229_v22 = vld [vmem:[%s2327_s15 + $0x230] sm:$0xff]  ;;  %v2688_v26 = vld [vmem:[%s2332_s18 + $0x1a0] sm:$0xff] }
  0x96   : > { %v594_v14 = vadd.f32 %v593_v4, %v2653_v58  ;;  %v751_v31 = vmul.f32 %v229_v22, %v229_v22 }
  0x97   : > { %v479_v40 = vadd.f32 %v478_v29, %v224_v49  ;;  %v872_v50 = vadd.f32 %v871_v39, %v745_v33  ;;  %v970_v49 = vmul.f32 %v2520_v43, %v2520_v43  ;;  %v1095_v21 = vadd.f32 %v1094_v11, %v968_v36  ;;  %v230_v33 = vld [vmem:[%s2327_s15 + $0x238] sm:$0xff]  ;;  %v2695_v36 = vld [vmem:[%s2332_s18 + $0x1a8] sm:$0xff] }
  0x98   : > { %v595_v25 = vadd.f32 %v594_v14, %v2660_v0  ;;  %v752_v43 = vmul.f32 %v230_v33, %v230_v33 }
  0x99   : > { %v480_v51 = vadd.f32 %v479_v40, %v225_v56  ;;  %v873_v60 = vadd.f32 %v872_v50, %v746_v41  ;;  %v971_v56 = vmul.f32 %v2527_v54, %v2527_v54  ;;  %v1096_v37 = vadd.f32 %v1095_v21, %v969_v42  ;;  %v231_v41 = vld [vmem:[%s2327_s15 + $0x240] sm:$0xff]  ;;  %v2702_v42 = vld [vmem:[%s2332_s18 + $0x1b0] sm:$0xff] }
  0x9a   : > { %v596_v39 = vadd.f32 %v595_v25, %v2667_v7  ;;  %v753_v54 = vmul.f32 %v231_v41, %v231_v41 }
  0x9b   : > { %v481_v61 = vadd.f32 %v480_v51, %v226_v63  ;;  %v874_v28 = vadd.f32 %v873_v60, %v747_v53  ;;  %v972_v63 = vmul.f32 %v2534_v62, %v2534_v62  ;;  %v1097_v47 = vadd.f32 %v1096_v37, %v970_v49  ;;  %v232_v53 = vld [vmem:[%s2327_s15 + $0x248] sm:$0xff]  ;;  %v2709_v49 = vld [vmem:[%s2332_s18 + $0x1b8] sm:$0xff] }
  0x9c   : > { %v597_v50 = vadd.f32 %v596_v39, %v2674_v13  ;;  %v754_v62 = vmul.f32 %v232_v53, %v232_v53 }
  0x9d   : > { %v482_v9 = vadd.f32 %v481_v61, %v227_v8  ;;  %v875_v16 = vadd.f32 %v874_v28, %v748_v27  ;;  %v973_v8 = vmul.f32 %v2541_v10, %v2541_v10  ;;  %v1098_v24 = vadd.f32 %v1097_v47, %v971_v56  ;;  %v233_v27 = vld [vmem:[%s2327_s15 + $0x250] sm:$0xff]  ;;  %v2716_v56 = vld [vmem:[%s2332_s18 + $0x1c0] sm:$0xff] }
  0x9e   : > { %v598_v60 = vadd.f32 %v597_v50, %v2681_v19  ;;  %v755_v10 = vmul.f32 %v233_v27, %v233_v27 }
  0x9f   : > { %v483_v18 = vadd.f32 %v482_v9, %v228_v15  ;;  %v876_v29 = vadd.f32 %v875_v16, %v749_v6  ;;  %v974_v15 = vmul.f32 %v2548_v20, %v2548_v20  ;;  %v1099_v4 = vadd.f32 %v1098_v24, %v972_v63  ;;  %v234_v6 = vld [vmem:[%s2327_s15 + $0x258] sm:$0xff]  ;;  %v2723_v63 = vld [vmem:[%s2332_s18 + $0x1c8] sm:$0xff] }
  0xa0   : > { %v599_v28 = vadd.f32 %v598_v60, %v2688_v26  ;;  %v756_v20 = vmul.f32 %v234_v6, %v234_v6 }
  0xa1   : > { %v484_v32 = vadd.f32 %v483_v18, %v229_v22  ;;  %v877_v40 = vadd.f32 %v876_v29, %v750_v17  ;;  %v975_v22 = vmul.f32 %v2555_v34, %v2555_v34  ;;  %v1100_v14 = vadd.f32 %v1099_v4, %v973_v8  ;;  %v235_v17 = vld [vmem:[%s2327_s15 + $0x260] sm:$0xff]  ;;  %v2730_v8 = vld [vmem:[%s2332_s18 + $0x1d0] sm:$0xff] }
  0xa2   : > { %v600_v16 = vadd.f32 %v599_v28, %v2695_v36  ;;  %v757_v34 = vmul.f32 %v235_v17, %v235_v17 }
  0xa3   : > { %v485_v44 = vadd.f32 %v484_v32, %v230_v33  ;;  %v878_v51 = vadd.f32 %v877_v40, %v751_v31  ;;  %v976_v33 = vmul.f32 %v2562_v45, %v2562_v45  ;;  %v1101_v25 = vadd.f32 %v1100_v14, %v974_v15  ;;  %v236_v31 = vld [vmem:[%s2327_s15 + $0x268] sm:$0xff]  ;;  %v2737_v15 = vld [vmem:[%s2332_s18 + $0x1d8] sm:$0xff] }
  0xa4   : > { %v601_v29 = vadd.f32 %v600_v16, %v2702_v42  ;;  %v758_v45 = vmul.f32 %v236_v31, %v236_v31 }
  0xa5   : > { %v486_v55 = vadd.f32 %v485_v44, %v231_v41  ;;  %v879_v61 = vadd.f32 %v878_v51, %v752_v43  ;;  %v977_v41 = vmul.f32 %v2569_v57, %v2569_v57  ;;  %v1102_v39 = vadd.f32 %v1101_v25, %v975_v22  ;;  %v237_v43 = vld [vmem:[%s2327_s15 + $0x270] sm:$0xff]  ;;  %v2744_v22 = vld [vmem:[%s2332_s18 + $0x1e0] sm:$0xff] }
  0xa6   : > { %v602_v40 = vadd.f32 %v601_v29, %v2709_v49  ;;  %v759_v57 = vmul.f32 %v237_v43, %v237_v43 }
  0xa7   : > { %v487_v2 = vadd.f32 %v486_v55, %v232_v53  ;;  %v880_v9 = vadd.f32 %v879_v61, %v753_v54  ;;  %v978_v53 = vmul.f32 %v2576_v3, %v2576_v3  ;;  %v1103_v50 = vadd.f32 %v1102_v39, %v976_v33  ;;  %v238_v54 = vld [vmem:[%s2327_s15 + $0x278] sm:$0xff]  ;;  %v2751_v33 = vld [vmem:[%s2332_s18 + $0x1e8] sm:$0xff] }
  0xa8   : > { %v603_v51 = vadd.f32 %v602_v40, %v2716_v56  ;;  %v760_v3 = vmul.f32 %v238_v54, %v238_v54 }
  0xa9   : > { %v488_v11 = vadd.f32 %v487_v2, %v233_v27  ;;  %v881_v18 = vadd.f32 %v880_v9, %v754_v62  ;;  %v979_v27 = vmul.f32 %v2583_v12, %v2583_v12  ;;  %v1104_v60 = vadd.f32 %v1103_v50, %v977_v41  ;;  %v239_v62 = vld [vmem:[%s2327_s15 + $0x280] sm:$0xff]  ;;  %v2758_v41 = vld [vmem:[%s2332_s18 + $0x1f0] sm:$0xff] }
  0xaa   : > { %v604_v61 = vadd.f32 %v603_v51, %v2723_v63  ;;  %v761_v12 = vmul.f32 %v239_v62, %v239_v62 }
  0xab   : > { %v489_v21 = vadd.f32 %v488_v11, %v234_v6  ;;  %v882_v32 = vadd.f32 %v881_v18, %v755_v10  ;;  %v980_v6 = vmul.f32 %v2590_v23, %v2590_v23  ;;  %v1105_v28 = vadd.f32 %v1104_v60, %v978_v53  ;;  %v240_v10 = vld [vmem:[%s2327_s15 + $0x288] sm:$0xff]  ;;  %v2765_v53 = vld [vmem:[%s2332_s18 + $0x1f8] sm:$0xff] }
  0xac   : > { %v605_v9 = vadd.f32 %v604_v61, %v2730_v8  ;;  %v762_v23 = vmul.f32 %v240_v10, %v240_v10 }
  0xad   : > { %v490_v37 = vadd.f32 %v489_v21, %v235_v17  ;;  %v883_v44 = vadd.f32 %v882_v32, %v756_v20  ;;  %v981_v17 = vmul.f32 %v2597_v38, %v2597_v38  ;;  %v1106_v16 = vadd.f32 %v1105_v28, %v979_v27  ;;  %v241_v20 = vld [vmem:[%s2327_s15 + $0x290] sm:$0xff]  ;;  %v2772_v27 = vld [vmem:[%s2332_s18 + $0x200] sm:$0xff] }
  0xae   : > { %v606_v18 = vadd.f32 %v605_v9, %v2737_v15  ;;  %v763_v38 = vmul.f32 %v241_v20, %v241_v20 }
  0xaf   : > { %v491_v47 = vadd.f32 %v490_v37, %v236_v31  ;;  %v884_v55 = vadd.f32 %v883_v44, %v757_v34  ;;  %v982_v31 = vmul.f32 %v2604_v48, %v2604_v48  ;;  %v1107_v29 = vadd.f32 %v1106_v16, %v980_v6  ;;  %v242_v34 = vld [vmem:[%s2327_s15 + $0x298] sm:$0xff]  ;;  %v2779_v6 = vld [vmem:[%s2332_s18 + $0x208] sm:$0xff] }
  0xb0   : > { %v607_v32 = vadd.f32 %v606_v18, %v2744_v22  ;;  %v764_v48 = vmul.f32 %v242_v34, %v242_v34 }
  0xb1   : > { %v492_v24 = vadd.f32 %v491_v47, %v237_v43  ;;  %v885_v2 = vadd.f32 %v884_v55, %v758_v45  ;;  %v983_v43 = vmul.f32 %v2611_v59, %v2611_v59  ;;  %v1108_v40 = vadd.f32 %v1107_v29, %v981_v17  ;;  %v243_v45 = vld [vmem:[%s2327_s15 + $0x2a0] sm:$0xff]  ;;  %v2786_v17 = vld [vmem:[%s2332_s18 + $0x210] sm:$0xff] }
  0xb2   : > { %v608_v44 = vadd.f32 %v607_v32, %v2751_v33  ;;  %v765_v59 = vmul.f32 %v243_v45, %v243_v45 }
  0xb3   : > { %v493_v4 = vadd.f32 %v492_v24, %v238_v54  ;;  %v886_v11 = vadd.f32 %v885_v2, %v759_v57  ;;  %v984_v54 = vmul.f32 %v2618_v5, %v2618_v5  ;;  %v1109_v51 = vadd.f32 %v1108_v40, %v982_v31  ;;  %v244_v57 = vld [vmem:[%s2327_s15 + $0x2a8] sm:$0xff]  ;;  %v2793_v31 = vld [vmem:[%s2332_s18 + $0x218] sm:$0xff] }
  0xb4   : > { %v609_v55 = vadd.f32 %v608_v44, %v2758_v41  ;;  %v766_v5 = vmul.f32 %v244_v57, %v244_v57 }
  0xb5   : > { %v494_v14 = vadd.f32 %v493_v4, %v239_v62  ;;  %v887_v21 = vadd.f32 %v886_v11, %v760_v3  ;;  %v985_v62 = vmul.f32 %v2625_v35, %v2625_v35  ;;  %v1110_v61 = vadd.f32 %v1109_v51, %v983_v43  ;;  %v245_v3 = vld [vmem:[%s2327_s15 + $0x2b0] sm:$0xff]  ;;  %v2800_v43 = vld [vmem:[%s2332_s18 + $0x220] sm:$0xff] }
  0xb6   : > { %v610_v2 = vadd.f32 %v609_v55, %v2765_v53  ;;  %v767_v35 = vmul.f32 %v245_v3, %v245_v3 }
  0xb7   : > { %v495_v25 = vadd.f32 %v494_v14, %v240_v10  ;;  %v888_v37 = vadd.f32 %v887_v21, %v761_v12  ;;  %v986_v10 = vmul.f32 %v2632_v1, %v2632_v1  ;;  %v1111_v9 = vadd.f32 %v1110_v61, %v984_v54  ;;  %v246_v12 = vld [vmem:[%s2327_s15 + $0x2b8] sm:$0xff]  ;;  %v2807_v54 = vld [vmem:[%s2332_s18 + $0x228] sm:$0xff] }
  0xb8   : > { %v611_v11 = vadd.f32 %v610_v2, %v2772_v27  ;;  %v768_v1 = vmul.f32 %v246_v12, %v246_v12 }
  0xb9   : > { %v496_v39 = vadd.f32 %v495_v25, %v241_v20  ;;  %v889_v47 = vadd.f32 %v888_v37, %v762_v23  ;;  %v987_v20 = vmul.f32 %v2639_v46, %v2639_v46  ;;  %v1112_v18 = vadd.f32 %v1111_v9, %v985_v62  ;;  %v247_v23 = vld [vmem:[%s2327_s15 + $0x2c0] sm:$0xff]  ;;  %v2814_v62 = vld [vmem:[%s2332_s18 + $0x230] sm:$0xff] }
  0xba   : > { %v612_v21 = vadd.f32 %v611_v11, %v2779_v6  ;;  %v769_v46 = vmul.f32 %v247_v23, %v247_v23 }
  0xbb   : > { %v497_v50 = vadd.f32 %v496_v39, %v242_v34  ;;  %v890_v24 = vadd.f32 %v889_v47, %v763_v38  ;;  %v988_v34 = vmul.f32 %v2646_v52, %v2646_v52  ;;  %v1113_v32 = vadd.f32 %v1112_v18, %v986_v10  ;;  %v248_v38 = vld [vmem:[%s2327_s15 + $0x2c8] sm:$0xff]  ;;  %v2821_v10 = vld [vmem:[%s2332_s18 + $0x238] sm:$0xff] }
  0xbc   : > { %v613_v37 = vadd.f32 %v612_v21, %v2786_v17  ;;  %v770_v52 = vmul.f32 %v248_v38, %v248_v38  ;;  %v2062_v18 = vld [vmem:[%s2332_s18 + $0x8] sm:$0xff]  ;;  %v2830_v21 = vld [vmem:[%s2332_s18 + $0x240] sm:$0xff] }
  0xbd   : > { %v498_v60 = vadd.f32 %v497_v50, %v243_v45  ;;  %v891_v4 = vadd.f32 %v890_v24, %v764_v48  ;;  %v989_v45 = vmul.f32 %v2653_v58, %v2653_v58  ;;  %v1114_v44 = vadd.f32 %v1113_v32, %v987_v20  ;;  %v249_v48 = vld [vmem:[%s2327_s15 + $0x2d0] sm:$0xff]  ;;  %v2061_v20 = vld [vmem:[%s2327_s15 + $0x8] sm:$0xff] }
  0xbe   : > { %v614_v47 = vadd.f32 %v613_v37, %v2793_v31  ;;  %v771_v58 = vmul.f32 %v249_v48, %v249_v48  ;;  %v2063_v37 = vld [vmem:[%s2327_s15 + $0x10] sm:$0xff] }
  0xbf   : > { %v499_v28 = vadd.f32 %v498_v60, %v244_v57  ;;  %v892_v14 = vadd.f32 %v891_v4, %v765_v59  ;;  %v990_v57 = vmul.f32 %v2660_v0, %v2660_v0  ;;  %v1115_v55 = vadd.f32 %v1114_v44, %v988_v34  ;;  %v250_v59 = vld [vmem:[%s2327_s15 + $0x2d8] sm:$0xff] }
  0xc0   : > { %v615_v24 = vadd.f32 %v614_v47, %v2800_v43  ;;  %v772_v4 = vmul.f32 %v250_v59, %v250_v59  ;;  %v994_v44 = vmul.f32 %v2688_v26, %v2688_v26  ;;  %v2066_v47 = vld [vmem:[%s2332_s18 + $0x18] sm:$0xff]  ;;  %v995_v26 = vmul.f32 %v2695_v36, %v2695_v36 }
  0xc1   : > { %v500_v16 = vadd.f32 %v499_v28, %v245_v3  ;;  %v893_v25 = vadd.f32 %v892_v14, %v766_v5  ;;  %v991_v3 = vmul.f32 %v2667_v7, %v2667_v7  ;;  %v1116_v2 = vadd.f32 %v1115_v55, %v989_v45  ;;  %v251_v5 = vld [vmem:[%s2327_s15 + $0x2e0] sm:$0xff] }
  0xc2   : > { %v616_v0 = vadd.f32 %v615_v24, %v2807_v54  ;;  %v773_v14 = vmul.f32 %v251_v5, %v251_v5  ;;  %v2849_v24 = vld [vmem:[%s2332_s18 + $0x250] sm:$0xff]  ;;  %v996_v36 = vmul.f32 %v2702_v42, %v2702_v42  ;;  %v997_v42 = vmul.f32 %v2709_v49, %v2709_v49 }
  0xc3   : > { %v501_v29 = vadd.f32 %v500_v16, %v246_v12  ;;  %v894_v39 = vadd.f32 %v893_v25, %v767_v35  ;;  %v992_v12 = vmul.f32 %v2674_v13, %v2674_v13  ;;  %v1117_v11 = vadd.f32 %v1116_v2, %v990_v57  ;;  %v252_v35 = vld [vmem:[%s2327_s15 + $0x2e8] sm:$0xff] }
  0xc4   : > { %v617_v7 = vadd.f32 %v616_v0, %v2814_v62  ;;  %v993_v13 = vmul.f32 %v2681_v19, %v2681_v19  ;;  %v774_v32 = vmul.f32 %v252_v35, %v252_v35  ;;  %v998_v49 = vmul.f32 %v2716_v56, %v2716_v56 }
  0xc5   : > { %v502_v40 = vadd.f32 %v501_v29, %v247_v23  ;;  %v895_v50 = vadd.f32 %v894_v39, %v768_v1  ;;  %v1204_v23 = vmul.f32 %v2062_v18, %v2061_v20  ;;  %v1118_v25 = vadd.f32 %v1117_v11, %v991_v3  ;;  %v253_v29 = vld [vmem:[%s2327_s15 + $0x2f0] sm:$0xff]  ;;  %v2068_v3 = vld [vmem:[%s2332_s18 + $0x20] sm:$0xff] }
  0xc6   : > { %v618_v34 = vadd.f32 %v617_v7, %v2821_v10  ;;  %v775_v57 = vmul.f32 %v253_v29, %v253_v29  ;;  %v2070_v7 = vld [vmem:[%s2332_s18 + $0x28] sm:$0xff]  ;;  %v999_v56 = vmul.f32 %v2723_v63, %v2723_v63  ;;  %v1000_v63 = vmul.f32 %v2730_v8, %v2730_v8 }
  0xc7   : > { %v503_v51 = vadd.f32 %v502_v40, %v248_v38  ;;  %v896_v60 = vadd.f32 %v895_v50, %v769_v46  ;;  %v2064_v46 = vld [vmem:[%s2332_s18 + $0x10] sm:$0xff]  ;;  %v2839_v40 = vld [vmem:[%s2332_s18 + $0x248] sm:$0xff]  ;;  %v1119_v19 = vadd.f32 %v1118_v25, %v992_v12  ;;  %v254_v50 = vld [vmem:[%s2327_s15 + $0x2f8] sm:$0xff]  ;;  %v1001_v8 = vmul.f32 %v2737_v15, %v2737_v15 }
  0xc8   : > { %v1205_v39 = vmul.f32 %v2064_v46, %v2063_v37  ;;  %v257_v37 = vld [vmem:[%s2327_s15 + $0x310] sm:$0xff]  ;;  %v1002_v15 = vmul.f32 %v2744_v22, %v2744_v22  ;;  %v1003_v22 = vmul.f32 %v2751_v33, %v2751_v33  ;;  %v1004_v33 = vmul.f32 %v2758_v41, %v2758_v41 }
  0xc9   : > { %v504_v61 = vadd.f32 %v503_v51, %v249_v48  ;;  %v897_v28 = vadd.f32 %v896_v60, %v770_v52  ;;  %v2065_v48 = vld [vmem:[%s2327_s15 + $0x18] sm:$0xff]  ;;  %v619_v51 = vadd.f32 %v618_v34, %v2830_v21  ;;  %v1120_v60 = vadd.f32 %v1119_v19, %v993_v13  ;;  %v2867_v13 = vld [vmem:[%s2332_s18 + $0x260] sm:$0xff]  ;;  %v2071_v34 = vld [vmem:[%s2327_s15 + $0x30] sm:$0xff] }
  0xca   : > { %v1206_v52 = vmul.f32 %v2066_v47, %v2065_v48  ;;  %v2876_v19 = vld [vmem:[%s2332_s18 + $0x268] sm:$0xff]  ;;  %v1005_v41 = vmul.f32 %v2765_v53, %v2765_v53  ;;  %v1006_v53 = vmul.f32 %v2772_v27, %v2772_v27 }
  0xcb   : > { %v505_v9 = vadd.f32 %v504_v61, %v250_v59  ;;  %v898_v16 = vadd.f32 %v897_v28, %v771_v58  ;;  %v1331_v59 = vadd.f32 %v1204_v23, %v2375_v30  ;;  %v2067_v61 = vld [vmem:[%s2327_s15 + $0x20] sm:$0xff]  ;;  %v620_v0 = vadd.f32 %v619_v51, %v2839_v40 }
  0xcc   : > { %v1207_v2 = vmul.f32 %v2068_v3, %v2067_v61  ;;  %v1121_v11 = vadd.f32 %v1120_v60, %v994_v44  ;;  %v2885_v60 = vld [vmem:[%s2332_s18 + $0x270] sm:$0xff] }
  0xcd   : > { %v506_v1 = vadd.f32 %v505_v9, %v251_v5  ;;  %v899_v38 = vadd.f32 %v898_v16, %v772_v4  ;;  %v255_v5 = vld [vmem:[%s2327_s15 + $0x300] sm:$0xff]  ;;  %v776_v4 = vmul.f32 %v254_v50, %v254_v50  ;;  %v1332_v30 = vadd.f32 %v1331_v59, %v1205_v39  ;;  %v2858_v9 = vld [vmem:[%s2332_s18 + $0x258] sm:$0xff]  ;;  %v256_v16 = vld [vmem:[%s2327_s15 + $0x308] sm:$0xff] }
  0xce   : > { %v621_v20 = vadd.f32 %v620_v0, %v2849_v24  ;;  %v777_v18 = vmul.f32 %v255_v5, %v255_v5  ;;  %v778_v39 = vmul.f32 %v256_v16, %v256_v16  ;;  %v779_v59 = vmul.f32 %v257_v37, %v257_v37 }
  0xcf   : > { %v507_v45 = vadd.f32 %v506_v1, %v252_v35  ;;  %v900_v55 = vadd.f32 %v899_v38, %v773_v14  ;;  %v2069_v35 = vld [vmem:[%s2327_s15 + $0x28] sm:$0xff]  ;;  %v1333_v1 = vadd.f32 %v1332_v30, %v1206_v52  ;;  %v2073_v52 = vld [vmem:[%s2327_s15 + $0x38] sm:$0xff] }
  0xd0   : > { %v1208_v14 = vmul.f32 %v2070_v7, %v2069_v35  ;;  %v622_v46 = vadd.f32 %v621_v20, %v2858_v9 }
  0xd1   : > { %v508_v58 = vadd.f32 %v507_v45, %v253_v29  ;;  %v901_v28 = vadd.f32 %v900_v55, %v774_v32  ;;  %v1122_v29 = vadd.f32 %v1121_v11, %v995_v26  ;;  %v2072_v32 = vld [vmem:[%s2332_s18 + $0x30] sm:$0xff]  ;;  %v1334_v44 = vadd.f32 %v1333_v1, %v1207_v2  ;;  %v2075_v2 = vld [vmem:[%s2327_s15 + $0x40] sm:$0xff]  ;;  %v2894_v11 = vld [vmem:[%s2332_s18 + $0x278] sm:$0xff] }
  0xd2   : > { %v1209_v38 = vmul.f32 %v2072_v32, %v2071_v34  ;;  %v623_v55 = vadd.f32 %v622_v46, %v2867_v13 }
  0xd3   : > { %v509_v12 = vadd.f32 %v508_v58, %v254_v50  ;;  %v902_v23 = vadd.f32 %v901_v28, %v775_v57  ;;  %v1123_v47 = vadd.f32 %v1122_v29, %v996_v36  ;;  %v2074_v50 = vld [vmem:[%s2332_s18 + $0x38] sm:$0xff]  ;;  %v1335_v26 = vadd.f32 %v1334_v44, %v1208_v14  ;;  %v2077_v14 = vld [vmem:[%s2327_s15 + $0x48] sm:$0xff]  ;;  %v2903_v29 = vld [vmem:[%s2332_s18 + $0x280] sm:$0xff] }
  0xd4   : > { %v1210_v51 = vmul.f32 %v2074_v50, %v2073_v52  ;;  %v258_v57 = vld [vmem:[%s2327_s15 + $0x318] sm:$0xff]  ;;  %v624_v28 = vadd.f32 %v623_v55, %v2876_v19 }
  0xd5   : > { %v510_v25 = vadd.f32 %v509_v12, %v255_v5  ;;  %v903_v45 = vadd.f32 %v902_v23, %v776_v4  ;;  %v1124_v3 = vadd.f32 %v1123_v47, %v997_v42  ;;  %v2076_v5 = vld [vmem:[%s2332_s18 + $0x40] sm:$0xff]  ;;  %v780_v30 = vmul.f32 %v258_v57, %v258_v57  ;;  %v2912_v47 = vld [vmem:[%s2332_s18 + $0x288] sm:$0xff] }
  0xd6   : > { %v1211_v0 = vmul.f32 %v2076_v5, %v2075_v2  ;;  %v259_v4 = vld [vmem:[%s2327_s15 + $0x320] sm:$0xff]  ;;  %v1336_v36 = vadd.f32 %v1335_v26, %v1209_v38  ;;  %v625_v23 = vadd.f32 %v624_v28, %v2885_v60  ;;  %v2079_v38 = vld [vmem:[%s2327_s15 + $0x50] sm:$0xff] }
  0xd7   : > { %v511_v48 = vadd.f32 %v510_v25, %v256_v16  ;;  %v904_v58 = vadd.f32 %v903_v45, %v777_v18  ;;  %v1125_v7 = vadd.f32 %v1124_v3, %v998_v49  ;;  %v2078_v16 = vld [vmem:[%s2332_s18 + $0x48] sm:$0xff]  ;;  %v781_v1 = vmul.f32 %v259_v4, %v259_v4  ;;  %v2921_v3 = vld [vmem:[%s2332_s18 + $0x290] sm:$0xff] }
  0xd8   : > { %v1212_v20 = vmul.f32 %v2078_v16, %v2077_v14  ;;  %v260_v18 = vld [vmem:[%s2327_s15 + $0x328] sm:$0xff]  ;;  %v1337_v42 = vadd.f32 %v1336_v36, %v1210_v51  ;;  %v626_v45 = vadd.f32 %v625_v23, %v2894_v11  ;;  %v2081_v51 = vld [vmem:[%s2327_s15 + $0x58] sm:$0xff] }
  0xd9   : > { %v512_v61 = vadd.f32 %v511_v48, %v257_v37  ;;  %v905_v12 = vadd.f32 %v904_v58, %v778_v39  ;;  %v1126_v32 = vadd.f32 %v1125_v7, %v999_v56  ;;  %v2080_v37 = vld [vmem:[%s2332_s18 + $0x50] sm:$0xff]  ;;  %v782_v44 = vmul.f32 %v260_v18, %v260_v18  ;;  %v2930_v7 = vld [vmem:[%s2332_s18 + $0x298] sm:$0xff] }
  0xda   : > { %v1213_v46 = vmul.f32 %v2080_v37, %v2079_v38  ;;  %v261_v39 = vld [vmem:[%s2327_s15 + $0x330] sm:$0xff]  ;;  %v1338_v49 = vadd.f32 %v1337_v42, %v1211_v0  ;;  %v627_v58 = vadd.f32 %v626_v45, %v2903_v29  ;;  %v2083_v0 = vld [vmem:[%s2327_s15 + $0x60] sm:$0xff] }
  0xdb   : > { %v513_v35 = vadd.f32 %v512_v61, %v258_v57  ;;  %v906_v25 = vadd.f32 %v905_v12, %v779_v59  ;;  %v1127_v50 = vadd.f32 %v1126_v32, %v1000_v63  ;;  %v2082_v57 = vld [vmem:[%s2332_s18 + $0x58] sm:$0xff]  ;;  %v783_v26 = vmul.f32 %v261_v39, %v261_v39  ;;  %v2939_v32 = vld [vmem:[%s2332_s18 + $0x2a0] sm:$0xff] }
  0xdc   : > { %v1214_v55 = vmul.f32 %v2082_v57, %v2081_v51  ;;  %v262_v59 = vld [vmem:[%s2327_s15 + $0x338] sm:$0xff]  ;;  %v1339_v56 = vadd.f32 %v1338_v49, %v1212_v20  ;;  %v628_v12 = vadd.f32 %v627_v58, %v2912_v47  ;;  %v2085_v20 = vld [vmem:[%s2327_s15 + $0x68] sm:$0xff] }
  0xdd   : > { %v514_v34 = vadd.f32 %v513_v35, %v259_v4  ;;  %v907_v48 = vadd.f32 %v906_v25, %v780_v30  ;;  %v1128_v5 = vadd.f32 %v1127_v50, %v1001_v8  ;;  %v2084_v4 = vld [vmem:[%s2332_s18 + $0x60] sm:$0xff]  ;;  %v784_v36 = vmul.f32 %v262_v59, %v262_v59  ;;  %v2948_v50 = vld [vmem:[%s2332_s18 + $0x2a8] sm:$0xff] }
  0xde   : > { %v1215_v28 = vmul.f32 %v2084_v4, %v2083_v0  ;;  %v263_v30 = vld [vmem:[%s2327_s15 + $0x340] sm:$0xff]  ;;  %v1340_v63 = vadd.f32 %v1339_v56, %v1213_v46  ;;  %v629_v25 = vadd.f32 %v628_v12, %v2921_v3  ;;  %v2087_v46 = vld [vmem:[%s2327_s15 + $0x70] sm:$0xff]  ;;  %v1007_v4 = vmul.f32 %v2779_v6, %v2779_v6 }
  0xdf   : > { %v515_v52 = vadd.f32 %v514_v34, %v260_v18  ;;  %v908_v61 = vadd.f32 %v907_v48, %v781_v1  ;;  %v1129_v16 = vadd.f32 %v1128_v5, %v1002_v15  ;;  %v2086_v18 = vld [vmem:[%s2332_s18 + $0x68] sm:$0xff]  ;;  %v785_v42 = vmul.f32 %v263_v30, %v263_v30  ;;  %v2957_v5 = vld [vmem:[%s2332_s18 + $0x2b0] sm:$0xff] }
  0xe0   : > { %v1216_v23 = vmul.f32 %v2086_v18, %v2085_v20  ;;  %v264_v1 = vld [vmem:[%s2327_s15 + $0x348] sm:$0xff]  ;;  %v1341_v8 = vadd.f32 %v1340_v63, %v1214_v55  ;;  %v630_v48 = vadd.f32 %v629_v25, %v2930_v7  ;;  %v2089_v55 = vld [vmem:[%s2327_s15 + $0x78] sm:$0xff]  ;;  %v1008_v6 = vmul.f32 %v2786_v17, %v2786_v17  ;;  %v2095_v17 = vld [vmem:[%s2327_s15 + $0x90] sm:$0xff] }
  0xe1   : > { %v516_v2 = vadd.f32 %v515_v52, %v261_v39  ;;  %v909_v35 = vadd.f32 %v908_v61, %v782_v44  ;;  %v1130_v37 = vadd.f32 %v1129_v16, %v1003_v22  ;;  %v2088_v39 = vld [vmem:[%s2332_s18 + $0x70] sm:$0xff]  ;;  %v786_v49 = vmul.f32 %v264_v1, %v264_v1  ;;  %v2966_v16 = vld [vmem:[%s2332_s18 + $0x2b8] sm:$0xff]  ;;  %v2093_v25 = vld [vmem:[%s2327_s15 + $0x88] sm:$0xff] }
  0xe2   : > { %v1217_v45 = vmul.f32 %v2088_v39, %v2087_v46  ;;  %v265_v44 = vld [vmem:[%s2327_s15 + $0x350] sm:$0xff]  ;;  %v1342_v15 = vadd.f32 %v1341_v8, %v1215_v28  ;;  %v631_v61 = vadd.f32 %v630_v48, %v2939_v32  ;;  %v2091_v28 = vld [vmem:[%s2327_s15 + $0x80] sm:$0xff] }
  0xe3   : > { %v517_v14 = vadd.f32 %v516_v2, %v262_v59  ;;  %v910_v34 = vadd.f32 %v909_v35, %v783_v26  ;;  %v1131_v57 = vadd.f32 %v1130_v37, %v1004_v33  ;;  %v2090_v59 = vld [vmem:[%s2332_s18 + $0x78] sm:$0xff]  ;;  %v787_v56 = vmul.f32 %v265_v44, %v265_v44  ;;  %v267_v33 = vld [vmem:[%s2327_s15 + $0x360] sm:$0xff]  ;;  %v2096_v39 = vld [vmem:[%s2332_s18 + $0x90] sm:$0xff] }
  0xe4   : > { %v1218_v58 = vmul.f32 %v2090_v59, %v2089_v55  ;;  %v266_v26 = vld [vmem:[%s2327_s15 + $0x358] sm:$0xff]  ;;  %v1343_v22 = vadd.f32 %v1342_v15, %v1216_v23  ;;  %v1009_v37 = vmul.f32 %v2793_v31, %v2793_v31  ;;  %v268_v15 = vld [vmem:[%s2327_s15 + $0x368] sm:$0xff] }
  0xe5   : > { %v518_v38 = vadd.f32 %v517_v14, %v263_v30  ;;  %v911_v52 = vadd.f32 %v910_v34, %v784_v36  ;;  %v1132_v27 = vadd.f32 %v1131_v57, %v1005_v41  ;;  %v2092_v30 = vld [vmem:[%s2332_s18 + $0x80] sm:$0xff]  ;;  %v632_v36 = vadd.f32 %v631_v61, %v2948_v50  ;;  %v2097_v55 = vld [vmem:[%s2327_s15 + $0x98] sm:$0xff]  ;;  %v2991_v61 = vld [vmem:[%s2332_s18 + $0x2d0] sm:$0xff] }
  0xe6   : > { %v1219_v12 = vmul.f32 %v2092_v30, %v2091_v28  ;;  %v788_v35 = vmul.f32 %v266_v26, %v266_v26  ;;  %v1344_v14 = vadd.f32 %v1343_v22, %v1217_v45  ;;  %v789_v41 = vmul.f32 %v267_v33, %v267_v33  ;;  %v2098_v59 = vld [vmem:[%s2332_s18 + $0x98] sm:$0xff] }
  0xe7   : > { %v519_v51 = vadd.f32 %v518_v38, %v264_v1  ;;  %v912_v2 = vadd.f32 %v911_v52, %v785_v42  ;;  %v1133_v18 = vadd.f32 %v1132_v27, %v1006_v53  ;;  %v633_v23 = vadd.f32 %v632_v36, %v2957_v5  ;;  %v2094_v42 = vld [vmem:[%s2332_s18 + $0x88] sm:$0xff]  ;;  %v2974_v38 = vld [vmem:[%s2332_s18 + $0x2c0] sm:$0xff]  ;;  %v2999_v36 = vld [vmem:[%s2327_s15 + $0x370] sm:$0xff] }
  0xe8   : > { %v1220_v34 = vmul.f32 %v2094_v42, %v2093_v25  ;;  %v1345_v8 = vadd.f32 %v1344_v14, %v1218_v58  ;;  %v1221_v45 = vmul.f32 %v2096_v39, %v2095_v17  ;;  %v1010_v53 = vmul.f32 %v2800_v43, %v2800_v43  ;;  %v2100_v43 = vld [vmem:[%s2332_s18 + $0xa0] sm:$0xff]  ;;  %3768 = vst [vmem:[#allocation6_spill] sm:$0xff] %v2999_v36  ;;  %v2103_v42 = vld [vmem:[%s2327_s15 + $0xb0] sm:$0xff]  ;;  %v3021_v39 = vld [vmem:[%s2327_s15 + $0x378] sm:$0xff] }
  0xe9   : > { %v520_v0 = vadd.f32 %v519_v51, %v265_v44  ;;  %v913_v63 = vadd.f32 %v912_v2, %v786_v49  ;;  %v1134_v46 = vadd.f32 %v1133_v18, %v1007_v4  ;;  %v634_v48 = vadd.f32 %v633_v23, %v2966_v16  ;;  %v2983_v51 = vld [vmem:[%s2332_s18 + $0x2c8] sm:$0xff]  ;;  %v3010_v23 = vld [vmem:[%s2332_s18 + $0x2e0] sm:$0xff]  ;;  %3769 = vst [vmem:[#allocation7_spill] sm:$0xff] %v3021_v39 }
  0xea   : > { %v1346_v52 = vadd.f32 %v1345_v8, %v1219_v12  ;;  %v1222_v58 = vmul.f32 %v2098_v59, %v2097_v55  ;;  %v1011_v2 = vmul.f32 %v2807_v54, %v2807_v54  ;;  %v1013_v25 = vmul.f32 %v2821_v10, %v2821_v10  ;;  %v2107_v59 = vld [vmem:[%s2327_s15 + $0xc0] sm:$0xff] }
  0xeb   : > { %v521_v20 = vadd.f32 %v520_v0, %v266_v26  ;;  %v914_v1 = vadd.f32 %v913_v63, %v787_v56  ;;  %v1135_v57 = vadd.f32 %v1134_v46, %v1008_v6  ;;  %v635_v31 = vadd.f32 %v634_v48, %v2974_v38  ;;  %v2099_v0 = vld [vmem:[%s2327_s15 + $0xa0] sm:$0xff] }
  0xec   : > { %v1347_v26 = vadd.f32 %v1346_v52, %v1220_v34  ;;  %v790_v56 = vmul.f32 %v268_v15, %v268_v15  ;;  %v1223_v4 = vmul.f32 %v2100_v43, %v2099_v0  ;;  %v1012_v63 = vmul.f32 %v2814_v62, %v2814_v62  ;;  %v2104_v34 = vld [vmem:[%s2332_s18 + $0xb0] sm:$0xff]  ;;  %v2106_v52 = vld [vmem:[%s2332_s18 + $0xb8] sm:$0xff]  ;;  %v3043_v43 = vld [vmem:[%s2327_s15 + $0x380] sm:$0xff] }
  0xed   : > { %v522_v44 = vadd.f32 %v521_v20, %v267_v33  ;;  %v915_v49 = vadd.f32 %v914_v1, %v788_v35  ;;  %v1136_v22 = vadd.f32 %v1135_v57, %v1009_v37  ;;  %v636_v28 = vadd.f32 %v635_v31, %v2983_v51  ;;  %v3002_v35 = vld [vmem:[%s2332_s18 + $0x2d8] sm:$0xff]  ;;  %v2101_v33 = vld [vmem:[%s2327_s15 + $0xa8] sm:$0xff]  ;;  %v3032_v57 = vld [vmem:[%s2332_s18 + $0x2f0] sm:$0xff]  ;;  %3770 = vst [vmem:[#allocation8_spill] sm:$0xff] %v3043_v43 }
  0xee   : > { %v1348_v12 = vadd.f32 %v1347_v26, %v1221_v45  ;;  %v2102_v20 = vld [vmem:[%s2332_s18 + $0xa8] sm:$0xff]  ;;  %v791_v1 = vmul.f32 %v2999_v36, %v2999_v36  ;;  %v1225_v8 = vmul.f32 %v2104_v34, %v2103_v42  ;;  %v1014_v10 = vmul.f32 %v2830_v21, %v2830_v21 }
  0xef   : > { %v523_v27 = vadd.f32 %v522_v44, %v268_v15  ;;  %v916_v30 = vadd.f32 %v915_v49, %v789_v41  ;;  %v1137_v54 = vadd.f32 %v1136_v22, %v1010_v53  ;;  %v637_v14 = vadd.f32 %v636_v28, %v2991_v61  ;;  %v3024_v45 = vld [vmem:[%s2332_s18 + $0x2e8] sm:$0xff]  ;;  %v2105_v49 = vld [vmem:[%s2327_s15 + $0xb8] sm:$0xff] }
  0xf0   : > { %v1224_v6 = vmul.f32 %v2102_v20, %v2101_v33  ;;  %v1349_v18 = vadd.f32 %v1348_v12, %v1222_v58  ;;  %v1226_v15 = vmul.f32 %v2106_v52, %v2105_v49  ;;  %v792_v31 = vmul.f32 %v3021_v39, %v3021_v39  ;;  %v2108_v58 = vld [vmem:[%s2332_s18 + $0xc0] sm:$0xff]  ;;  %v2110_v12 = vld [vmem:[%s2332_s18 + $0xc8] sm:$0xff]  ;;  %v3076_v49 = vld [vmem:[%s2332_s18 + $0x310] sm:$0xff] }
  0xf1   : > { %v1138_v62 = vadd.f32 %v1137_v54, %v1011_v2  ;;  %v524_v41 = vadd.f32 %v523_v27, %v2999_v36  ;;  %v638_v37 = vadd.f32 %v637_v14, %v3002_v35  ;;  %v917_v46 = vadd.f32 %v916_v30, %v790_v56  ;;  %v2109_v30 = vld [vmem:[%s2327_s15 + $0xc8] sm:$0xff]  ;;  %v3054_v14 = vld [vmem:[%s2332_s18 + $0x300] sm:$0xff] }
  0xf2   : > { %v1350_v17 = vadd.f32 %v1349_v18, %v1223_v4  ;;  %v1015_v55 = vmul.f32 %v2839_v40, %v2839_v40  ;;  %v1227_v26 = vmul.f32 %v2108_v58, %v2107_v59  ;;  %v3046_v4 = vld [vmem:[%s2332_s18 + $0x2f8] sm:$0xff]  ;;  %v1016_v40 = vmul.f32 %v2849_v24, %v2849_v24  ;;  %v2112_v18 = vld [vmem:[%s2332_s18 + $0xd0] sm:$0xff] }
  0xf3   : > { %v1139_v44 = vadd.f32 %v1138_v62, %v1012_v63  ;;  %v639_v48 = vadd.f32 %v638_v37, %v3010_v23  ;;  %v525_v56 = vadd.f32 %v524_v41, %v3021_v39  ;;  %v918_v22 = vadd.f32 %v917_v46, %v791_v1  ;;  %v3068_v41 = vld [vmem:[%s2332_s18 + $0x308] sm:$0xff]  ;;  %v3354_v39 = vld [vmem:[%s2332_s18 + $0x3d8] sm:$0xff] }
  0xf4   : > { %v1351_v53 = vadd.f32 %v1350_v17, %v1224_v6  ;;  %v1228_v63 = vmul.f32 %v2110_v12, %v2109_v30  ;;  %v793_v33 = vmul.f32 %v3043_v43, %v3043_v43  ;;  %v1017_v20 = vmul.f32 %v2858_v9, %v2858_v9  ;;  %v2111_v6 = vld [vmem:[%s2327_s15 + $0xd0] sm:$0xff]  ;;  %v2113_v17 = vld [vmem:[%s2327_s15 + $0xd8] sm:$0xff]  ;;  %v3098_v12 = vld [vmem:[%s2332_s18 + $0x320] sm:$0xff] }
  0xf5   : > { %v1140_v21 = vadd.f32 %v1139_v44, %v1013_v25  ;;  %v640_v2 = vadd.f32 %v639_v48, %v3024_v45  ;;  %v1229_v1 = vmul.f32 %v2112_v18, %v2111_v6  ;;  %v526_v25 = vadd.f32 %v525_v56, %v3043_v43  ;;  %v3087_v56 = vld [vmem:[%s2327_s15 + $0x390] sm:$0xff] }
  0xf6   : > { %v1352_v0 = vadd.f32 %v1351_v53, %v1225_v8  ;;  %v919_v42 = vadd.f32 %v918_v22, %v792_v31  ;;  %v3065_v8 = vld [vmem:[%s2327_s15 + $0x388] sm:$0xff]  ;;  %v1018_v9 = vmul.f32 %v2867_v13, %v2867_v13  ;;  %v2115_v53 = vld [vmem:[%s2327_s15 + $0xe0] sm:$0xff]  ;;  %3772 = vst [vmem:[#allocation10_spill] sm:$0xff] %v3087_v56  ;;  %v1042_v43 = vmul.f32 %v3098_v12, %v3098_v12 }
  0xf7   : > { %v1141_v27 = vadd.f32 %v1140_v21, %v1014_v10  ;;  %v641_v28 = vadd.f32 %v640_v2, %v3032_v57  ;;  %3771 = vst [vmem:[#allocation9_spill] sm:$0xff] %v3065_v8  ;;  %v2114_v10 = vld [vmem:[%s2332_s18 + $0xd8] sm:$0xff]  ;;  %v794_v52 = vmul.f32 %v3065_v8, %v3065_v8  ;;  %v2116_v31 = vld [vmem:[%s2332_s18 + $0xe0] sm:$0xff]  ;;  %v527_v21 = vadd.f32 %v526_v25, %v3065_v8  ;;  %v3332_v8 = vld [vmem:[%s2332_s18 + $0x3c8] sm:$0xff] }
  0xf8   : > { %v1353_v54 = vadd.f32 %v1352_v0, %v1226_v15  ;;  %v1230_v44 = vmul.f32 %v2114_v10, %v2113_v17  ;;  %v1019_v15 = vmul.f32 %v2876_v19, %v2876_v19  ;;  %v920_v58 = vadd.f32 %v919_v42, %v793_v33  ;;  %v3090_v2 = vld [vmem:[%s2332_s18 + $0x318] sm:$0xff]  ;;  %v2119_v33 = vld [vmem:[%s2327_s15 + $0xf0] sm:$0xff]  ;;  %v3112_v42 = vld [vmem:[%s2332_s18 + $0x328] sm:$0xff]  ;;  %3793 = vst [vmem:[#allocation31_spill] sm:$0xff] %v3332_v8 }
  0xf9   : > { %v1142_v24 = vadd.f32 %v1141_v27, %v1015_v55  ;;  %v642_v62 = vadd.f32 %v641_v28, %v3046_v4  ;;  %v1231_v55 = vmul.f32 %v2116_v31, %v2115_v53  ;;  %v1020_v19 = vmul.f32 %v2885_v60, %v2885_v60  ;;  %v2118_v27 = vld [vmem:[%s2332_s18 + $0xe8] sm:$0xff]  ;;  %3774 = vst [vmem:[#allocation12_spill] sm:$0xff] %v3112_v42 }
  0xfa   : > { %v1354_v34 = vadd.f32 %v1353_v54, %v1227_v26  ;;  %v1021_v54 = vmul.f32 %v2894_v11, %v2894_v11  ;;  %v528_v6 = vadd.f32 %v527_v21, %v3087_v56  ;;  %v1022_v11 = vmul.f32 %v2903_v29, %v2903_v29 }
  0xfb   : > { %v1143_v37 = vadd.f32 %v1142_v24, %v1016_v40  ;;  %v643_v46 = vadd.f32 %v642_v62, %v3054_v14  ;;  %v2117_v40 = vld [vmem:[%s2327_s15 + $0xe8] sm:$0xff]  ;;  %v3109_v62 = vld [vmem:[%s2327_s15 + $0x398] sm:$0xff] }
  0xfc   : > { %v1355_v48 = vadd.f32 %v1354_v34, %v1228_v63  ;;  %v1232_v28 = vmul.f32 %v2118_v27, %v2117_v40  ;;  %v795_v63 = vmul.f32 %v3087_v56, %v3087_v56  ;;  %3773 = vst [vmem:[#allocation11_spill] sm:$0xff] %v3109_v62  ;;  %v529_v31 = vadd.f32 %v528_v6, %v3109_v62  ;;  %v2126_v40 = vld [vmem:[%s2332_s18 + $0x108] sm:$0xff] }
  0xfd   : > { %v1144_v13 = vadd.f32 %v1143_v37, %v1017_v20  ;;  %v644_v59 = vadd.f32 %v643_v46, %v3068_v41  ;;  %v2120_v20 = vld [vmem:[%s2332_s18 + $0xf0] sm:$0xff]  ;;  %v2121_v37 = vld [vmem:[%s2327_s15 + $0xf8] sm:$0xff]  ;;  %v1040_v56 = vmul.f32 %v3076_v49, %v3076_v49 }
  0xfe   : > { %v1356_v26 = vadd.f32 %v1355_v48, %v1229_v1  ;;  %v1233_v24 = vmul.f32 %v2120_v20, %v2119_v33  ;;  %v921_v1 = vadd.f32 %v920_v58, %v794_v52  ;;  %v2122_v46 = vld [vmem:[%s2332_s18 + $0xf8] sm:$0xff]  ;;  %v796_v48 = vmul.f32 %v3109_v62, %v3109_v62  ;;  %v3131_v58 = vld [vmem:[%s2327_s15 + $0x3a0] sm:$0xff]  ;;  %v2128_v33 = vld [vmem:[%s2332_s18 + $0x110] sm:$0xff] }
  0xff   : > { %v1145_v22 = vadd.f32 %v1144_v13, %v1018_v9  ;;  %v645_v0 = vadd.f32 %v644_v59, %v3076_v49  ;;  %v1234_v17 = vmul.f32 %v2122_v46, %v2121_v37  ;;  %v1023_v52 = vmul.f32 %v2912_v47, %v2912_v47  ;;  %v2124_v13 = vld [vmem:[%s2332_s18 + $0x100] sm:$0xff]  ;;  %3776 = vst [vmem:[#allocation14_spill] sm:$0xff] %v3131_v58  ;;  %v2129_v46 = vld [vmem:[%s2327_s15 + $0x118] sm:$0xff] }
 0x100   : > { %v1357_v30 = vadd.f32 %v1356_v26, %v1230_v44  ;;  %v3120_v44 = vld [vmem:[%s2332_s18 + $0x330] sm:$0xff]  ;;  %v922_v21 = vadd.f32 %v921_v1, %v795_v63  ;;  %v3134_v26 = vld [vmem:[%s2332_s18 + $0x338] sm:$0xff]  ;;  %v1024_v47 = vmul.f32 %v2921_v3, %v2921_v3  ;;  %v797_v63 = vmul.f32 %v3131_v58, %v3131_v58 }
 0x101   : > { %v1146_v60 = vadd.f32 %v1145_v22, %v1019_v15  ;;  %v646_v18 = vadd.f32 %v645_v0, %v3090_v2  ;;  %3775 = vst [vmem:[#allocation13_spill] sm:$0xff] %v3120_v44  ;;  %v2123_v15 = vld [vmem:[%s2327_s15 + $0x100] sm:$0xff]  ;;  %3777 = vst [vmem:[#allocation15_spill] sm:$0xff] %v3134_v26  ;;  %v2125_v0 = vld [vmem:[%s2327_s15 + $0x108] sm:$0xff]  ;;  %v1044_v36 = vmul.f32 %v3120_v44, %v3120_v44 }
 0x102   : > { %v1358_v25 = vadd.f32 %v1357_v30, %v1231_v55  ;;  %v1235_v53 = vmul.f32 %v2124_v13, %v2123_v15  ;;  %v1236_v27 = vmul.f32 %v2126_v40, %v2125_v0  ;;  %v3142_v30 = vld [vmem:[%s2332_s18 + $0x340] sm:$0xff]  ;;  %v1027_v15 = vmul.f32 %v2948_v50, %v2948_v50  ;;  %v3178_v0 = vld [vmem:[%s2332_s18 + $0x358] sm:$0xff] }
 0x103   : > { %v1147_v34 = vadd.f32 %v1146_v60, %v1020_v19  ;;  %v647_v9 = vadd.f32 %v646_v18, %v3098_v12  ;;  %3778 = vst [vmem:[#allocation16_spill] sm:$0xff] %v3142_v30  ;;  %v2127_v60 = vld [vmem:[%s2327_s15 + $0x110] sm:$0xff]  ;;  %v923_v18 = vadd.f32 %v922_v21, %v796_v48  ;;  %v1028_v40 = vmul.f32 %v2957_v5, %v2957_v5  ;;  %v3310_v62 = vld [vmem:[%s2332_s18 + $0x3b8] sm:$0xff] }
 0x104   : > { %v1359_v10 = vadd.f32 %v1358_v25, %v1232_v28  ;;  %v1237_v20 = vmul.f32 %v2128_v33, %v2127_v60  ;;  %v3153_v25 = vld [vmem:[%s2327_s15 + $0x3a8] sm:$0xff]  ;;  %3790 = vst [vmem:[#allocation28_spill] sm:$0xff] %v3310_v62 }
 0x105   : > { %v1148_v29 = vadd.f32 %v1147_v34, %v1021_v54  ;;  %v648_v55 = vadd.f32 %v647_v9, %v3112_v42  ;;  %v1025_v54 = vmul.f32 %v2930_v7, %v2930_v7  ;;  %3779 = vst [vmem:[#allocation17_spill] sm:$0xff] %v3153_v25  ;;  %v1026_v34 = vmul.f32 %v2939_v32, %v2939_v32 }
 0x106   : > { %v1360_v59 = vadd.f32 %v1359_v10, %v1233_v24  ;;  %v530_v24 = vadd.f32 %v529_v31, %v3131_v58  ;;  %v798_v48 = vmul.f32 %v3153_v25, %v3153_v25  ;;  %v2132_v31 = vld [vmem:[%s2332_s18 + $0x120] sm:$0xff]  ;;  %v1038_v58 = vmul.f32 %v3054_v14, %v3054_v14 }
 0x107   : > { %v1149_v19 = vadd.f32 %v1148_v29, %v1022_v11  ;;  %v649_v22 = vadd.f32 %v648_v55, %v3120_v44  ;;  %v3156_v11 = vld [vmem:[%s2332_s18 + $0x348] sm:$0xff]  ;;  %v3164_v29 = vld [vmem:[%s2332_s18 + $0x350] sm:$0xff] }
 0x108   : > { %v1361_v28 = vadd.f32 %v1360_v59, %v1234_v17  ;;  %3780 = vst [vmem:[#allocation18_spill] sm:$0xff] %v3156_v11  ;;  %v2130_v17 = vld [vmem:[%s2332_s18 + $0x118] sm:$0xff]  ;;  %3781 = vst [vmem:[#allocation19_spill] sm:$0xff] %v3164_v29  ;;  %v531_v21 = vadd.f32 %v530_v24, %v3153_v25  ;;  %v3186_v24 = vld [vmem:[%s2332_s18 + $0x360] sm:$0xff] }
 0x109   : > { %v1150_v3 = vadd.f32 %v1149_v19, %v1023_v52  ;;  %v650_v6 = vadd.f32 %v649_v22, %v3134_v26  ;;  %v1238_v10 = vmul.f32 %v2130_v17, %v2129_v46  ;;  %v3175_v22 = vld [vmem:[%s2327_s15 + $0x3b0] sm:$0xff]  ;;  %3783 = vst [vmem:[#allocation21_spill] sm:$0xff] %v3186_v24  ;;  %v3288_v25 = vld [vmem:[%s2332_s18 + $0x3a8] sm:$0xff] }
 0x10a   : > { %v1362_v1 = vadd.f32 %v1361_v28, %v1235_v53  ;;  %v2131_v53 = vld [vmem:[%s2327_s15 + $0x120] sm:$0xff]  ;;  %3782 = vst [vmem:[#allocation20_spill] sm:$0xff] %v3175_v22  ;;  %v3376_v44 = vld [vmem:[%s2332_s18 + $0x3e8] sm:$0xff] }
 0x10b   : > { %v1151_v9 = vadd.f32 %v1150_v3, %v1024_v47  ;;  %v651_v37 = vadd.f32 %v650_v6, %v3142_v30  ;;  %v1239_v55 = vmul.f32 %v2132_v31, %v2131_v53  ;;  %v924_v47 = vadd.f32 %v923_v18, %v797_v63  ;;  %v2134_v3 = vld [vmem:[%s2332_s18 + $0x128] sm:$0xff]  ;;  %v2135_v18 = vld [vmem:[%s2327_s15 + $0x130] sm:$0xff]  ;;  %v2137_v31 = vld [vmem:[%s2327_s15 + $0x138] sm:$0xff] }
 0x10c   : > { %v1363_v52 = vadd.f32 %v1362_v1, %v1236_v27  ;;  %v799_v63 = vmul.f32 %v3175_v22, %v3175_v22  ;;  %v2136_v1 = vld [vmem:[%s2332_s18 + $0x130] sm:$0xff] }
 0x10d   : > { %v1152_v13 = vadd.f32 %v1151_v9, %v1025_v54  ;;  %v652_v59 = vadd.f32 %v651_v37, %v3156_v11  ;;  %v2133_v54 = vld [vmem:[%s2327_s15 + $0x128] sm:$0xff]  ;;  %v532_v9 = vadd.f32 %v531_v21, %v3175_v22  ;;  %v925_v46 = vadd.f32 %v924_v47, %v798_v48  ;;  %v2138_v21 = vld [vmem:[%s2332_s18 + $0x138] sm:$0xff] }
 0x10e   : > { %v1364_v19 = vadd.f32 %v1363_v52, %v1237_v20  ;;  %v1240_v60 = vmul.f32 %v2134_v3, %v2133_v54  ;;  %v1029_v20 = vmul.f32 %v2966_v16, %v2966_v16  ;;  %v3200_v52 = vld [vmem:[%s2332_s18 + $0x368] sm:$0xff]  ;;  %v1036_v22 = vmul.f32 %v3032_v57, %v3032_v57 }
 0x10f   : > { %v1153_v27 = vadd.f32 %v1152_v13, %v1026_v34  ;;  %v653_v28 = vadd.f32 %v652_v59, %v3164_v29  ;;  %v1241_v34 = vmul.f32 %v2136_v1, %v2135_v18  ;;  %v1030_v13 = vmul.f32 %v2974_v38, %v2974_v38  ;;  %v3219_v18 = vld [vmem:[%s2327_s15 + $0x3c0] sm:$0xff]  ;;  %v3222_v1 = vld [vmem:[%s2332_s18 + $0x378] sm:$0xff] }
 0x110   : > { %v1365_v33 = vadd.f32 %v1364_v19, %v1238_v10  ;;  %v3197_v10 = vld [vmem:[%s2327_s15 + $0x3b8] sm:$0xff]  ;;  %v1242_v59 = vmul.f32 %v2138_v21, %v2137_v31  ;;  %3785 = vst [vmem:[#allocation23_spill] sm:$0xff] %v3219_v18  ;;  %v3230_v21 = vld [vmem:[%s2332_s18 + $0x380] sm:$0xff] }
 0x111   : > { %v1154_v6 = vadd.f32 %v1153_v27, %v1027_v15  ;;  %v654_v37 = vadd.f32 %v653_v28, %v3178_v0  ;;  %3784 = vst [vmem:[#allocation22_spill] sm:$0xff] %v3197_v10  ;;  %v3208_v27 = vld [vmem:[%s2332_s18 + $0x370] sm:$0xff]  ;;  %v800_v48 = vmul.f32 %v3197_v10, %v3197_v10  ;;  %v2140_v28 = vld [vmem:[%s2332_s18 + $0x140] sm:$0xff]  ;;  %v533_v3 = vadd.f32 %v532_v9, %v3197_v10  ;;  %v2142_v9 = vld [vmem:[%s2332_s18 + $0x148] sm:$0xff] }
 0x112   : > { %v1366_v17 = vadd.f32 %v1365_v33, %v1239_v55  ;;  %v1031_v55 = vmul.f32 %v2983_v51, %v2983_v51  ;;  %v3266_v10 = vld [vmem:[%s2332_s18 + $0x398] sm:$0xff] }
 0x113   : > { %v1155_v15 = vadd.f32 %v1154_v6, %v1028_v40  ;;  %v655_v53 = vadd.f32 %v654_v37, %v3186_v24  ;;  %v2139_v40 = vld [vmem:[%s2327_s15 + $0x140] sm:$0xff]  ;;  %v1032_v37 = vmul.f32 %v2991_v61, %v2991_v61 }
 0x114   : > { %v1367_v19 = vadd.f32 %v1366_v17, %v1240_v60  ;;  %v1243_v54 = vmul.f32 %v2140_v28, %v2139_v40  ;;  %v926_v60 = vadd.f32 %v925_v46, %v799_v63  ;;  %v801_v63 = vmul.f32 %v3219_v18, %v3219_v18 }
 0x115   : > { %v1156_v47 = vadd.f32 %v1155_v15, %v1029_v20  ;;  %v656_v33 = vadd.f32 %v655_v53, %v3200_v52  ;;  %v2141_v15 = vld [vmem:[%s2327_s15 + $0x148] sm:$0xff]  ;;  %v534_v40 = vadd.f32 %v533_v3, %v3219_v18  ;;  %v2146_v3 = vld [vmem:[%s2332_s18 + $0x158] sm:$0xff]  ;;  %v3252_v18 = vld [vmem:[%s2332_s18 + $0x390] sm:$0xff] }
 0x116   : > { %v1368_v6 = vadd.f32 %v1367_v19, %v1241_v34  ;;  %v1244_v31 = vmul.f32 %v2142_v9, %v2141_v15  ;;  %v1033_v34 = vmul.f32 %v3002_v35, %v3002_v35  ;;  %v2144_v19 = vld [vmem:[%s2332_s18 + $0x150] sm:$0xff]  ;;  %v3244_v15 = vld [vmem:[%s2332_s18 + $0x388] sm:$0xff]  ;;  %v1034_v9 = vmul.f32 %v3010_v23, %v3010_v23 }
 0x117   : > { %v1157_v20 = vadd.f32 %v1156_v47, %v1030_v13  ;;  %v657_v17 = vadd.f32 %v656_v33, %v3208_v27  ;;  %v2143_v13 = vld [vmem:[%s2327_s15 + $0x150] sm:$0xff] }
 0x118   : > { %v1369_v53 = vadd.f32 %v1368_v6, %v1242_v59  ;;  %v1245_v47 = vmul.f32 %v2144_v19, %v2143_v13  ;;  %v927_v59 = vadd.f32 %v926_v60, %v800_v48  ;;  %v3241_v6 = vld [vmem:[%s2327_s15 + $0x3c8] sm:$0xff]  ;;  %v2145_v13 = vld [vmem:[%s2327_s15 + $0x158] sm:$0xff] }
 0x119   : > { %v1158_v46 = vadd.f32 %v1157_v20, %v1031_v55  ;;  %v658_v28 = vadd.f32 %v657_v17, %v3222_v1  ;;  %3786 = vst [vmem:[#allocation24_spill] sm:$0xff] %v3241_v6  ;;  %v1246_v19 = vmul.f32 %v2146_v3, %v2145_v13  ;;  %v802_v48 = vmul.f32 %v3241_v6, %v3241_v6  ;;  %v3263_v3 = vld [vmem:[%s2327_s15 + $0x3d0] sm:$0xff] }
 0x11a   : > { %v1370_v33 = vadd.f32 %v1369_v53, %v1243_v54  ;;  %v1035_v54 = vmul.f32 %v3024_v45, %v3024_v45  ;;  %v2148_v53 = vld [vmem:[%s2332_s18 + $0x160] sm:$0xff]  ;;  %3787 = vst [vmem:[#allocation25_spill] sm:$0xff] %v3263_v3 }
 0x11b   : > { %v1159_v55 = vadd.f32 %v1158_v46, %v1032_v37  ;;  %v659_v20 = vadd.f32 %v658_v28, %v3230_v21  ;;  %v2147_v37 = vld [vmem:[%s2327_s15 + $0x160] sm:$0xff]  ;;  %v535_v28 = vadd.f32 %v534_v40, %v3241_v6  ;;  %v2150_v40 = vld [vmem:[%s2332_s18 + $0x168] sm:$0xff] }
 0x11c   : > { %v1371_v17 = vadd.f32 %v1370_v33, %v1244_v31  ;;  %v1247_v46 = vmul.f32 %v2148_v53, %v2147_v37  ;;  %v928_v31 = vadd.f32 %v927_v59, %v801_v63  ;;  %v2149_v37 = vld [vmem:[%s2327_s15 + $0x168] sm:$0xff]  ;;  %v3274_v6 = vld [vmem:[%s2332_s18 + $0x3a0] sm:$0xff]  ;;  %v803_v63 = vmul.f32 %v3263_v3, %v3263_v3 }
 0x11d   : > { %v1160_v60 = vadd.f32 %v1159_v55, %v1033_v34  ;;  %v660_v13 = vadd.f32 %v659_v20, %v3244_v15  ;;  %v1248_v53 = vmul.f32 %v2150_v40, %v2149_v37  ;;  %v3285_v40 = vld [vmem:[%s2327_s15 + $0x3d8] sm:$0xff] }
 0x11e   : > { %v1372_v33 = vadd.f32 %v1371_v17, %v1245_v47  ;;  %v1037_v47 = vmul.f32 %v3046_v4, %v3046_v4  ;;  %v2152_v17 = vld [vmem:[%s2332_s18 + $0x170] sm:$0xff]  ;;  %3788 = vst [vmem:[#allocation26_spill] sm:$0xff] %v3285_v40 }
 0x11f   : > { %v1161_v34 = vadd.f32 %v1160_v60, %v1034_v9  ;;  %v661_v55 = vadd.f32 %v660_v13, %v3252_v18  ;;  %v2151_v9 = vld [vmem:[%s2327_s15 + $0x170] sm:$0xff]  ;;  %v536_v13 = vadd.f32 %v535_v28, %v3263_v3  ;;  %v2154_v28 = vld [vmem:[%s2332_s18 + $0x178] sm:$0xff] }
 0x120   : > { %v1373_v20 = vadd.f32 %v1372_v33, %v1246_v19  ;;  %v1249_v60 = vmul.f32 %v2152_v17, %v2151_v9  ;;  %v929_v19 = vadd.f32 %v928_v31, %v802_v48  ;;  %v2153_v9 = vld [vmem:[%s2327_s15 + $0x178] sm:$0xff]  ;;  %v3296_v3 = vld [vmem:[%s2332_s18 + $0x3b0] sm:$0xff]  ;;  %v804_v48 = vmul.f32 %v3285_v40, %v3285_v40 }
 0x121   : > { %v1162_v59 = vadd.f32 %v1161_v34, %v1035_v54  ;;  %v662_v37 = vadd.f32 %v661_v55, %v3266_v10  ;;  %v1250_v17 = vmul.f32 %v2154_v28, %v2153_v9  ;;  %v3307_v28 = vld [vmem:[%s2327_s15 + $0x3e0] sm:$0xff] }
 0x122   : > { %v1374_v33 = vadd.f32 %v1373_v20, %v1247_v46  ;;  %v1039_v46 = vmul.f32 %v3068_v41, %v3068_v41  ;;  %v2156_v20 = vld [vmem:[%s2332_s18 + $0x180] sm:$0xff]  ;;  %3789 = vst [vmem:[#allocation27_spill] sm:$0xff] %v3307_v28 }
 0x123   : > { %v1163_v54 = vadd.f32 %v1162_v59, %v1036_v22  ;;  %v663_v34 = vadd.f32 %v662_v37, %v3274_v6  ;;  %v2155_v22 = vld [vmem:[%s2327_s15 + $0x180] sm:$0xff]  ;;  %v537_v37 = vadd.f32 %v536_v13, %v3285_v40  ;;  %v2158_v13 = vld [vmem:[%s2332_s18 + $0x188] sm:$0xff] }
 0x124   : > { %v1375_v55 = vadd.f32 %v1374_v33, %v1248_v53  ;;  %v1251_v59 = vmul.f32 %v2156_v20, %v2155_v22  ;;  %v930_v53 = vadd.f32 %v929_v19, %v803_v63  ;;  %v2157_v22 = vld [vmem:[%s2327_s15 + $0x188] sm:$0xff]  ;;  %v3318_v40 = vld [vmem:[%s2332_s18 + $0x3c0] sm:$0xff]  ;;  %v805_v63 = vmul.f32 %v3307_v28, %v3307_v28 }
 0x125   : > { %v1164_v31 = vadd.f32 %v1163_v54, %v1037_v47  ;;  %v664_v9 = vadd.f32 %v663_v34, %v3288_v25  ;;  %v1252_v20 = vmul.f32 %v2158_v13, %v2157_v22  ;;  %3791 = vst [vmem:[#allocation29_spill] sm:$0xff] %v3318_v40  ;;  %v3329_v13 = vld [vmem:[%s2327_s15 + $0x3e8] sm:$0xff] }
 0x126   : > { %v1376_v33 = vadd.f32 %v1375_v55, %v1249_v60  ;;  %v1041_v60 = vmul.f32 %v3090_v2, %v3090_v2  ;;  %v2160_v55 = vld [vmem:[%s2332_s18 + $0x190] sm:$0xff]  ;;  %3792 = vst [vmem:[#allocation30_spill] sm:$0xff] %v3329_v13 }
 0x127   : > { %v1165_v47 = vadd.f32 %v1164_v31, %v1038_v58  ;;  %v665_v54 = vadd.f32 %v664_v9, %v3296_v3  ;;  %v2159_v58 = vld [vmem:[%s2327_s15 + $0x190] sm:$0xff]  ;;  %v538_v9 = vadd.f32 %v537_v37, %v3307_v28  ;;  %v2162_v37 = vld [vmem:[%s2332_s18 + $0x198] sm:$0xff] }
 0x128   : > { %v1377_v34 = vadd.f32 %v1376_v33, %v1250_v17  ;;  %v1253_v31 = vmul.f32 %v2160_v55, %v2159_v58  ;;  %v931_v17 = vadd.f32 %v930_v53, %v804_v48  ;;  %v2161_v58 = vld [vmem:[%s2327_s15 + $0x198] sm:$0xff]  ;;  %v3340_v28 = vld [vmem:[%s2332_s18 + $0x3d0] sm:$0xff]  ;;  %v806_v48 = vmul.f32 %v3329_v13, %v3329_v13 }
 0x129   : > { %v1166_v19 = vadd.f32 %v1165_v47, %v1039_v46  ;;  %v666_v22 = vadd.f32 %v665_v54, %v3310_v62  ;;  %v1254_v55 = vmul.f32 %v2162_v37, %v2161_v58  ;;  %3794 = vst [vmem:[#allocation32_spill] sm:$0xff] %v3340_v28  ;;  %v3351_v37 = vld [vmem:[%s2327_s15 + $0x3f0] sm:$0xff] }
 0x12a   : > { %v1378_v33 = vadd.f32 %v1377_v34, %v1251_v59  ;;  %v1043_v59 = vmul.f32 %v3112_v42, %v3112_v42  ;;  %v2164_v34 = vld [vmem:[%s2332_s18 + $0x1a0] sm:$0xff]  ;;  %3795 = vst [vmem:[#allocation33_spill] sm:$0xff] %v3351_v37 }
 0x12b   : > { %v1167_v46 = vadd.f32 %v1166_v19, %v1040_v56  ;;  %v667_v47 = vadd.f32 %v666_v22, %v3318_v40  ;;  %v2163_v56 = vld [vmem:[%s2327_s15 + $0x1a0] sm:$0xff]  ;;  %v539_v22 = vadd.f32 %v538_v9, %v3329_v13  ;;  %v2166_v9 = vld [vmem:[%s2332_s18 + $0x1a8] sm:$0xff] }
 0x12c   : > { %v1379_v54 = vadd.f32 %v1378_v33, %v1252_v20  ;;  %v1255_v19 = vmul.f32 %v2164_v34, %v2163_v56  ;;  %v932_v20 = vadd.f32 %v931_v17, %v805_v63  ;;  %v2165_v56 = vld [vmem:[%s2327_s15 + $0x1a8] sm:$0xff]  ;;  %v3362_v13 = vld [vmem:[%s2332_s18 + $0x3e0] sm:$0xff]  ;;  %v807_v63 = vmul.f32 %v3351_v37, %v3351_v37 }
 0x12d   : > { %v1168_v53 = vadd.f32 %v1167_v46, %v1041_v60  ;;  %v668_v58 = vadd.f32 %v667_v47, %v3332_v8  ;;  %v1256_v34 = vmul.f32 %v2166_v9, %v2165_v56  ;;  %v3373_v9 = vld [vmem:[%s2327_s15 + $0x3f8] sm:$0xff] }
 0x12e   : > { %v1380_v33 = vadd.f32 %v1379_v54, %v1253_v31  ;;  %v1045_v31 = vmul.f32 %v3134_v26, %v3134_v26  ;;  %v2168_v54 = vld [vmem:[%s2332_s18 + $0x1b0] sm:$0xff]  ;;  %3796 = vst [vmem:[#allocation34_spill] sm:$0xff] %v3373_v9  ;;  %v1046_v26 = vmul.f32 %v3142_v30, %v3142_v30  ;;  %v1048_v30 = vmul.f32 %v3164_v29, %v3164_v29 }
 0x12f   : > { %v1169_v60 = vadd.f32 %v1168_v53, %v1042_v43  ;;  %v669_v46 = vadd.f32 %v668_v58, %v3340_v28  ;;  %v2167_v43 = vld [vmem:[%s2327_s15 + $0x1b0] sm:$0xff]  ;;  %v540_v58 = vadd.f32 %v539_v22, %v3351_v37 }
 0x130   : > { %v1381_v47 = vadd.f32 %v1380_v33, %v1254_v55  ;;  %v1257_v53 = vmul.f32 %v2168_v54, %v2167_v43  ;;  %v933_v55 = vadd.f32 %v932_v20, %v806_v48  ;;  %v2169_v43 = vld [vmem:[%s2327_s15 + $0x1b8] sm:$0xff]  ;;  %v808_v48 = vmul.f32 %v3373_v9, %v3373_v9 }
 0x131   : > { %v1170_v17 = vadd.f32 %v1169_v60, %v1043_v59  ;;  %v670_v56 = vadd.f32 %v669_v46, %v3354_v39  ;;  %v2170_v54 = vld [vmem:[%s2332_s18 + $0x1b8] sm:$0xff]  ;;  %v3384_v46 = vld [vmem:[%s2332_s18 + $0x3f0] sm:$0xff] }
 0x132   : > { %v1382_v33 = vadd.f32 %v1381_v47, %v1255_v19  ;;  %v1258_v22 = vmul.f32 %v2170_v54, %v2169_v43  ;;  %v1047_v19 = vmul.f32 %v3156_v11, %v3156_v11  ;;  %v2171_v47 = vld [vmem:[%s2327_s15 + $0x1c0] sm:$0xff]  ;;  %v3395_v54 = vld [vmem:[%s2332_s18 + $0x3f8] sm:$0xff] }
 0x133   : > { %v1171_v59 = vadd.f32 %v1170_v17, %v1044_v36  ;;  %v671_v60 = vadd.f32 %v670_v56, %v3362_v13  ;;  %v2172_v36 = vld [vmem:[%s2332_s18 + $0x1c0] sm:$0xff]  ;;  %v541_v56 = vadd.f32 %v540_v58, %v3373_v9  ;;  %v1049_v58 = vmul.f32 %v3178_v0, %v3178_v0 }
 0x134   : > { %v1383_v37 = vadd.f32 %v1382_v33, %v1256_v34  ;;  %v1259_v17 = vmul.f32 %v2172_v36, %v2171_v47  ;;  %v934_v33 = vadd.f32 %v933_v55, %v807_v63  ;;  %v2175_v63 = vld [vmem:[%s2327_s15 + $0x1d0] sm:$0xff]  ;;  %v1050_v9 = vmul.f32 %v3186_v24, %v3186_v24 }
 0x135   : > { %v1172_v20 = vadd.f32 %v1171_v59, %v1045_v31  ;;  %v672_v34 = vadd.f32 %v671_v60, %v3376_v44  ;;  %v2173_v31 = vld [vmem:[%s2327_s15 + $0x1c8] sm:$0xff]  ;;  %v542_v55 = vrot.slane %v541_v56, 4 }
 0x136   : > { %v1384_v43 = vadd.f32 %v1383_v37, %v1257_v53  ;;  %v2174_v59 = vld [vmem:[%s2332_s18 + $0x1c8] sm:$0xff]  ;;  %v2176_v37 = vld [vmem:[%s2332_s18 + $0x1d0] sm:$0xff] }
 0x137   : > { %v1173_v42 = vadd.f32 %v1172_v20, %v1046_v26  ;;  %v673_v11 = vadd.f32 %v672_v34, %v3384_v46  ;;  %v1260_v47 = vmul.f32 %v2174_v59, %v2173_v31  ;;  %v1261_v53 = vmul.f32 %v2176_v37, %v2175_v63  ;;  %v2179_v37 = vld [vmem:[%s2327_s15 + $0x1e0] sm:$0xff] }
 0x138   : > { %v1385_v36 = vadd.f32 %v1384_v43, %v1258_v22  ;;  %v935_v20 = vadd.f32 %v934_v33, %v808_v48  ;;  %v2177_v22 = vld [vmem:[%s2327_s15 + $0x1d8] sm:$0xff]  ;;  %v1051_v59 = vmul.f32 %v3200_v52, %v3200_v52 }
 0x139   : > { %v1174_v60 = vadd.f32 %v1173_v42, %v1047_v19  ;;  %v674_v26 = vadd.f32 %v673_v11, %v3395_v54  ;;  %v2178_v43 = vld [vmem:[%s2332_s18 + $0x1d8] sm:$0xff]  ;;  %v2180_v11 = vld [vmem:[%s2332_s18 + $0x1e0] sm:$0xff] }
 0x13a   : > { %v1386_v34 = vadd.f32 %v1385_v36, %v1259_v17  ;;  %v1262_v42 = vmul.f32 %v2178_v43, %v2177_v22  ;;  %v1263_v48 = vmul.f32 %v2180_v11, %v2179_v37  ;;  %v543_v17 = vadd.f32 %v542_v55, %v541_v56  ;;  %v2181_v22 = vld [vmem:[%s2327_s15 + $0x1e8] sm:$0xff]  ;;  %v2183_v37 = vld [vmem:[%s2327_s15 + $0x1f0] sm:$0xff]  ;;  %v2185_v11 = vld [vmem:[%s2327_s15 + $0x1f8] sm:$0xff] }
 0x13b   : > { %v1175_v29 = vadd.f32 %v1174_v60, %v1048_v30  ;;  %v675_v31 = vrot.slane %v674_v26, 4  ;;  %v936_v36 = vrot.slane %v935_v20, 4  ;;  %v1052_v60 = vmul.f32 %v3208_v27, %v3208_v27  ;;  %v2184_v56 = vld [vmem:[%s2332_s18 + $0x1f0] sm:$0xff] }
 0x13c   : > { %v1387_v19 = vadd.f32 %v1386_v34, %v1260_v47  ;;  %v2182_v47 = vld [vmem:[%s2332_s18 + $0x1e8] sm:$0xff]  ;;  %v1265_v55 = vmul.f32 %v2184_v56, %v2183_v37  ;;  %v2188_v37 = vld [vmem:[%s2332_s18 + $0x200] sm:$0xff] }
 0x13d   : > { %v1176_v63 = vadd.f32 %v1175_v29, %v1049_v58  ;;  %v676_v33 = vadd.f32 %v675_v31, %v674_v26  ;;  %v1264_v34 = vmul.f32 %v2182_v47, %v2181_v22  ;;  %v1053_v29 = vmul.f32 %v3222_v1, %v3222_v1  ;;  %v2187_v47 = vld [vmem:[%s2327_s15 + $0x200] sm:$0xff] }
 0x13e   : > { %v1388_v30 = vadd.f32 %v1387_v19, %v1261_v53  ;;  %v544_v53 = vrot.slane %v543_v17, 2  ;;  %v937_v31 = vadd.f32 %v936_v36, %v935_v20  ;;  %v1267_v20 = vmul.f32 %v2188_v37, %v2187_v47  ;;  %v2191_v47 = vld [vmem:[%s2327_s15 + $0x210] sm:$0xff]  ;;  %v2193_v37 = vld [vmem:[%s2327_s15 + $0x218] sm:$0xff] }
 0x13f   : > { %v1177_v24 = vadd.f32 %v1176_v63, %v1050_v9  ;;  %v677_v26 = vrot.slane %v676_v33, 2  ;;  %v1054_v9 = vmul.f32 %v3230_v21, %v3230_v21 }
 0x140   : > { %v1389_v43 = vadd.f32 %v1388_v30, %v1262_v42  ;;  %v2186_v42 = vld [vmem:[%s2332_s18 + $0x1f8] sm:$0xff] }
 0x141   : > { %v1178_v58 = vadd.f32 %v1177_v24, %v1051_v59  ;;  %v1266_v30 = vmul.f32 %v2186_v42, %v2185_v11  ;;  %v1055_v24 = vmul.f32 %v3244_v15, %v3244_v15  ;;  %v678_v36 = vadd.f32 %v677_v26, %v676_v33  ;;  %v2189_v11 = vld [vmem:[%s2327_s15 + $0x208] sm:$0xff] }
 0x142   : > { %v1390_v19 = vadd.f32 %v1389_v43, %v1263_v48  ;;  %v545_v48 = vadd.f32 %v544_v53, %v543_v17  ;;  %v938_v43 = vrot.slane %v937_v31, 2  ;;  %v2192_v17 = vld [vmem:[%s2332_s18 + $0x210] sm:$0xff] }
 0x143   : > { %v1179_v63 = vadd.f32 %v1178_v58, %v1052_v60  ;;  %v1056_v60 = vmul.f32 %v3252_v18, %v3252_v18  ;;  %v1269_v33 = vmul.f32 %v2192_v17, %v2191_v47  ;;  %v679_v53 = vrot.slane %v678_v36, 1  ;;  %v2196_v47 = vld [vmem:[%s2332_s18 + $0x220] sm:$0xff] }
 0x144   : > { %v1391_v22 = vadd.f32 %v1390_v19, %v1264_v34  ;;  %v2190_v34 = vld [vmem:[%s2332_s18 + $0x208] sm:$0xff]  ;;  %v939_v26 = vadd.f32 %v938_v43, %v937_v31 }
 0x145   : > { %v1180_v59 = vadd.f32 %v1179_v63, %v1053_v29  ;;  %v1268_v19 = vmul.f32 %v2190_v34, %v2189_v11  ;;  %v1057_v29 = vmul.f32 %v3266_v10, %v3266_v10  ;;  %v2195_v34 = vld [vmem:[%s2327_s15 + $0x220] sm:$0xff]  ;;  %v3447_v43 = vadd.f32 %v679_v53, %v678_v36 }
 0x146   : > { %v1392_v56 = vadd.f32 %v1391_v22, %v1265_v55  ;;  %v546_v55 = vrot.slane %v545_v48, 1  ;;  %v1271_v31 = vmul.f32 %v2196_v47, %v2195_v34  ;;  %v2199_v34 = vld [vmem:[%s2327_s15 + $0x230] sm:$0xff]  ;;  %v2202_v47 = vld [vmem:[%s2332_s18 + $0x238] sm:$0xff] }
 0x147   : > { %v1181_v58 = vadd.f32 %v1180_v59, %v1054_v9  ;;  %v1058_v9 = vmul.f32 %v3274_v6, %v3274_v6 }
 0x148   : > { %v1393_v42 = vadd.f32 %v1392_v56, %v1266_v30  ;;  %v2194_v30 = vld [vmem:[%s2332_s18 + $0x218] sm:$0xff] }
 0x149   : > { %v1182_v63 = vadd.f32 %v1181_v58, %v1055_v24  ;;  %v1270_v56 = vmul.f32 %v2194_v30, %v2193_v37  ;;  %v1059_v24 = vmul.f32 %v3288_v25, %v3288_v25 }
 0x14a   : > { %v1394_v22 = vadd.f32 %v1393_v42, %v1267_v20  ;;  %v547_v20 = vadd.f32 %v546_v55, %v545_v48  ;;  %v940_v42 = vrot.slane %v939_v26, 1  ;;  %v2200_v48 = vld [vmem:[%s2332_s18 + $0x230] sm:$0xff] }
 0x14b   : > { %v1183_v59 = vadd.f32 %v1182_v63, %v1056_v60  ;;  %v1060_v63 = vmul.f32 %v3296_v3, %v3296_v3  ;;  %v1273_v36 = vmul.f32 %v2200_v48, %v2199_v34  ;;  %v1472_v48 = vld [vmem:[#allocation2] sm:$0x1] }
 0x14c   : > { %v1395_v11 = vadd.f32 %v1394_v22, %v1268_v19  ;;  %v2197_v19 = vld [vmem:[%s2327_s15 + $0x228] sm:$0xff]  ;;  %v941_v55 = vadd.f32 %v940_v42, %v939_v26  ;;  %v1464_v53 = vmul.f32 0.0009765625, %v547_v20  ;;  %v1063_v26 = vmul.f32 %v3332_v8, %v3332_v8 }
 0x14d   : > { %v1184_v58 = vadd.f32 %v1183_v59, %v1057_v29  ;;  %v2198_v22 = vld [vmem:[%s2332_s18 + $0x228] sm:$0xff]  ;;  %v1061_v59 = vmul.f32 %v3310_v62, %v3310_v62  ;;  %v1065_v62 = vmul.f32 %v3354_v39, %v3354_v39 }
 0x14e   : > { %v1396_v60 = vadd.f32 %v1395_v11, %v1269_v33  ;;  %v1272_v37 = vmul.f32 %v2198_v22, %v2197_v19  ;;  %v1062_v11 = vmul.f32 %v3318_v40, %v3318_v40  ;;  %v2203_v22 = vld [vmem:[%s2327_s15 + $0x240] sm:$0xff] }
 0x14f   : > { %v1185_v17 = vadd.f32 %v1184_v58, %v1058_v9  ;;  %v3458_v9 = vmul.f32 0.0009765625, %v3447_v43  ;;  %v1495_v40 = vld [vmem:[#allocation2 + $0x7] sm:$0x1] }
 0x150   : > { %v1397_v29 = vadd.f32 %v1396_v60, %v1270_v56  ;;  %v2201_v56 = vld [vmem:[%s2327_s15 + $0x238] sm:$0xff] }
 0x151   : > { %v1186_v30 = vadd.f32 %v1185_v17, %v1059_v24  ;;  %v1274_v60 = vmul.f32 %v2202_v47, %v2201_v56  ;;  %v1466_v24 = vmul.f32 %v1464_v53, %v547_v20  ;;  %v3465_v17 = vmul.f32 %v3458_v9, %v547_v20 }
 0x152   : > { %v1398_v33 = vadd.f32 %v1397_v29, %v1271_v31  ;;  %v1064_v31 = vmul.f32 %v3340_v28, %v3340_v28  ;;  %v2204_v29 = vld [vmem:[%s2332_s18 + $0x240] sm:$0xff]  ;;  %v1488_v56 = vmul.f32 %v1464_v53, %v1464_v53  ;;  %v1492_v20 = vmul.f32 %v3458_v9, %v3458_v9 }
 0x153   : > { %v1187_v58 = vadd.f32 %v1186_v30, %v1060_v63  ;;  %3797 = vst [vmem:[#allocation35_spill] sm:$0xff] %v3465_v17  ;;  %v1275_v63 = vmul.f32 %v2204_v29, %v2203_v22  ;;  %v1467_v34 = vsub.f32 %v941_v55, %v1466_v24  ;;  %v1473_v17 = vadd.f32 %v1472_v48, %v1464_v53  ;;  %v1487_v28 = vld [vmem:[#allocation2 + $0x5] sm:$0x1]  ;;  %v2206_v22 = vld [vmem:[%s2332_s18 + $0x248] sm:$0xff]  ;;  %v1491_v29 = vld [vmem:[#allocation2 + $0x6] sm:$0x1] }
 0x154   : > { %v1399_v19 = vadd.f32 %v1398_v33, %v1272_v37  ;;  %v1475_v37 = vld [vmem:[#allocation2 + $0x1] sm:$0x1]  ;;  %v1478_v33 = vld [vmem:[#allocation2 + $0x2] sm:$0x1]  ;;  %v1489_v24 = vadd.f32 %v1488_v56, %v1487_v28  ;;  %v1066_v28 = vmul.f32 %v3362_v13, %v3362_v13 }
 0x155   : > { %v1188_v42 = vadd.f32 %v1187_v58, %v1061_v59  ;;  %v1476_v8 = vadd.f32 %v1475_v37, %v3458_v9  ;;  %v1496_v59 = vmul.f32 %v3458_v9, %v1464_v53  ;;  %v2205_v58 = vld [vmem:[%s2327_s15 + $0x248] sm:$0xff]  ;;  %1474 = vst [vmem:[#allocation2] sm:$0x1] %v1473_v17  ;;  %v2207_v53 = vld [vmem:[%s2327_s15 + $0x250] sm:$0xff]  ;;  %v2209_v17 = vld [vmem:[%s2327_s15 + $0x258] sm:$0xff] }
 0x156   : > { %v1400_v30 = vadd.f32 %v1399_v19, %v1273_v36  ;;  %v1276_v36 = vmul.f32 %v2206_v22, %v2205_v58  ;;  %v1479_v19 = vadd.f32 %v1478_v33, %v1467_v34  ;;  %v2208_v37 = vld [vmem:[%s2332_s18 + $0x250] sm:$0xff]  ;;  %1490 = vst [vmem:[#allocation2 + $0x5] sm:$0x1] %v1489_v24  ;;  %v1067_v34 = vmul.f32 %v3376_v44, %v3376_v44  ;;  %v2211_v33 = vld [vmem:[%s2327_s15 + $0x260] sm:$0xff]  ;;  %v2213_v22 = vld [vmem:[%s2327_s15 + $0x268] sm:$0xff] }
 0x157   : > { %v1189_v47 = vadd.f32 %v1188_v42, %v1062_v11  ;;  %1477 = vst [vmem:[#allocation2 + $0x1] sm:$0x1] %v1476_v8  ;;  %v1493_v42 = vadd.f32 %v1492_v20, %v1491_v29  ;;  %v1497_v48 = vadd.f32 %v1496_v59, %v1495_v40  ;;  %v1277_v58 = vmul.f32 %v2208_v37, %v2207_v53  ;;  %v2210_v8 = vld [vmem:[%s2332_s18 + $0x258] sm:$0xff]  ;;  %v2212_v56 = vld [vmem:[%s2332_s18 + $0x260] sm:$0xff]  ;;  %v2215_v29 = vld [vmem:[%s2327_s15 + $0x270] sm:$0xff] }
 0x158   : > { %v1401_v55 = vadd.f32 %v1400_v30, %v1274_v60  ;;  %1480 = vst [vmem:[#allocation2 + $0x2] sm:$0x1] %v1479_v19  ;;  %v1279_v20 = vmul.f32 %v2212_v56, %v2211_v33  ;;  %v1069_v24 = vmul.f32 %v3395_v54, %v3395_v54  ;;  %v2217_v37 = vld [vmem:[%s2327_s15 + $0x278] sm:$0xff]  ;;  %v2222_v33 = vld [vmem:[%s2332_s18 + $0x288] sm:$0xff] }
 0x159   : > { %v1190_v11 = vadd.f32 %v1189_v47, %v1063_v26  ;;  %1494 = vst [vmem:[#allocation2 + $0x6] sm:$0x1] %v1493_v42  ;;  %1498 = vst [vmem:[#allocation2 + $0x7] sm:$0x1] %v1497_v48  ;;  %v1278_v26 = vmul.f32 %v2210_v8, %v2209_v17  ;;  %v2219_v17 = vld [vmem:[%s2327_s15 + $0x280] sm:$0xff] }
 0x15a   : > { %v1402_v60 = vadd.f32 %v1401_v55, %v1275_v63  ;;  %v2214_v55 = vld [vmem:[%s2332_s18 + $0x268] sm:$0xff]  ;;  %v2220_v8 = vld [vmem:[%s2332_s18 + $0x280] sm:$0xff] }
 0x15b   : > { %v1191_v30 = vadd.f32 %v1190_v11, %v1064_v31  ;;  %v1068_v31 = vmul.f32 %v3384_v46, %v3384_v46  ;;  %v2216_v11 = vld [vmem:[%s2332_s18 + $0x270] sm:$0xff] }
 0x15c   : > { %v1403_v40 = vadd.f32 %v1402_v60, %v1276_v36  ;;  %v1280_v36 = vmul.f32 %v2214_v55, %v2213_v22  ;;  %v1281_v42 = vmul.f32 %v2216_v11, %v2215_v29  ;;  %v2226_v11 = vld [vmem:[%s2327_s15 + $0x2a0] sm:$0xff] }
 0x15d   : > { %v1192_v63 = vadd.f32 %v1191_v30, %v1065_v62 }
 0x15e   : > { %v1404_v47 = vadd.f32 %v1403_v40, %v1277_v58  ;;  %v2218_v58 = vld [vmem:[%s2332_s18 + $0x278] sm:$0xff] }
 0x15f   : > { %v1193_v59 = vadd.f32 %v1192_v63, %v1066_v28  ;;  %v1282_v60 = vmul.f32 %v2218_v58, %v2217_v37  ;;  %v2221_v63 = vld [vmem:[%s2327_s15 + $0x288] sm:$0xff]  ;;  %v1468_v37 = vmul.f32 %v3458_v9, %v3447_v43  ;;  %v2230_v9 = vld [vmem:[%s2327_s15 + $0x2c0] sm:$0xff] }
 0x160   : > { %v1405_v19 = vadd.f32 %v1404_v47, %v1278_v26  ;;  %v1283_v26 = vmul.f32 %v2220_v8, %v2219_v17  ;;  %v1284_v56 = vmul.f32 %v2222_v33, %v2221_v63  ;;  %v2227_v58 = vld [vmem:[%s2327_s15 + $0x2a8] sm:$0xff]  ;;  %v2228_v17 = vld [vmem:[%s2327_s15 + $0x2b0] sm:$0xff] }
 0x161   : > { %v1194_v62 = vadd.f32 %v1193_v59, %v1067_v34  ;;  %v2224_v59 = vld [vmem:[%s2332_s18 + $0x290] sm:$0xff] }
 0x162   : > { %v1406_v48 = vadd.f32 %v1405_v19, %v1279_v20  ;;  %v2225_v19 = vld [vmem:[%s2327_s15 + $0x298] sm:$0xff] }
 0x163   : > { %v1195_v53 = vadd.f32 %v1194_v62, %v1068_v31  ;;  %v2223_v31 = vld [vmem:[%s2327_s15 + $0x290] sm:$0xff] }
 0x164   : > { %v1407_v28 = vadd.f32 %v1406_v48, %v1280_v36  ;;  %v1285_v22 = vmul.f32 %v2224_v59, %v2223_v31 }
 0x165   : > { %v1196_v30 = vadd.f32 %v1195_v53, %v1069_v24  ;;  %v1286_v24 = vmul.f32 %v2225_v19, %v2930_v7  ;;  %v1289_v7 = vmul.f32 %v2228_v17, %v2957_v5  ;;  %v2241_v17 = vld [vmem:[%s2327_s15 + $0x318] sm:$0xff] }
 0x166   : > { %v1408_v40 = vadd.f32 %v1407_v28, %v1281_v42  ;;  %v1287_v42 = vmul.f32 %v2226_v11, %v2939_v32 }
 0x167   : > { %v1197_v34 = vrot.slane %v1196_v30, 4 }
 0x168   : > { %v1409_v47 = vadd.f32 %v1408_v40, %v1282_v60  ;;  %v1288_v60 = vmul.f32 %v2227_v58, %v2948_v50  ;;  %v2229_v40 = vld [vmem:[%s2327_s15 + $0x2b8] sm:$0xff]  ;;  %v1291_v50 = vmul.f32 %v2230_v9, %v2974_v38  ;;  %v2239_v58 = vld [vmem:[%s2327_s15 + $0x308] sm:$0xff] }
 0x169   : > { %v1198_v20 = vadd.f32 %v1197_v34, %v1196_v30  ;;  %v1290_v34 = vmul.f32 %v2229_v40, %v2966_v16  ;;  %v2233_v16 = vld [vmem:[%s2327_s15 + $0x2d8] sm:$0xff] }
 0x16a   : > { %v1410_v55 = vadd.f32 %v1409_v47, %v1283_v26  ;;  %v1481_v26 = vld [vmem:[#allocation2 + $0x3] sm:$0x1]  ;;  %v3798_v40 = vld [vmem:[#allocation12_spill] sm:$0xff] }
 0x16b   : > { %v1199_v36 = vrot.slane %v1198_v20, 2 }
 0x16c   : > { %v1411_v62 = vadd.f32 %v1410_v55, %v1284_v56  ;;  %v2231_v56 = vld [vmem:[%s2327_s15 + $0x2c8] sm:$0xff] }
 0x16d   : > { %v1200_v29 = vadd.f32 %v1199_v36, %v1198_v20  ;;  %v1292_v5 = vmul.f32 %v2231_v56, %v2983_v51  ;;  %v2232_v20 = vld [vmem:[%s2327_s15 + $0x2d0] sm:$0xff]  ;;  %v2234_v36 = vld [vmem:[%s2327_s15 + $0x2e0] sm:$0xff] }
 0x16e   : > { %v1412_v48 = vadd.f32 %v1411_v62, %v1285_v22  ;;  %v1293_v31 = vmul.f32 %v2232_v20, %v2991_v61  ;;  %v1294_v22 = vmul.f32 %v2233_v16, %v3002_v35  ;;  %v1295_v38 = vmul.f32 %v2234_v36, %v3010_v23  ;;  %v3803_v36 = vld [vmem:[#allocation19_spill] sm:$0xff] }
 0x16f   : > { %v1201_v53 = vrot.slane %v1200_v29, 1 }
 0x170   : > { %v1413_v28 = vadd.f32 %v1412_v48, %v1286_v24  ;;  %v2235_v24 = vld [vmem:[%s2327_s15 + $0x2e8] sm:$0xff] }
 0x171   : > { %v1202_v30 = vadd.f32 %v1201_v53, %v1200_v29  ;;  %v1296_v51 = vmul.f32 %v2235_v24, %v3024_v45  ;;  %v2236_v29 = vld [vmem:[%s2327_s15 + $0x2f0] sm:$0xff]  ;;  %v2238_v53 = vld [vmem:[%s2327_s15 + $0x300] sm:$0xff]  ;;  %v1300_v45 = vmul.f32 %v2239_v58, %v3068_v41  ;;  %v2249_v24 = vld [vmem:[%s2327_s15 + $0x358] sm:$0xff] }
 0x172   : > { %v1414_v8 = vadd.f32 %v1413_v28, %v1287_v42  ;;  %v1297_v61 = vmul.f32 %v2236_v29, %v3032_v57  ;;  %v2237_v42 = vld [vmem:[%s2327_s15 + $0x2f8] sm:$0xff]  ;;  %v1299_v23 = vmul.f32 %v2238_v53, %v3054_v14  ;;  %v2240_v28 = vld [vmem:[%s2327_s15 + $0x310] sm:$0xff]  ;;  %v2250_v29 = vld [vmem:[%s2327_s15 + $0x360] sm:$0xff] }
 0x173   : > { %v1469_v32 = vsub.f32 %v1202_v30, %v1468_v37  ;;  %v1298_v35 = vmul.f32 %v2237_v42, %v3046_v4  ;;  %v1301_v57 = vmul.f32 %v2240_v28, %v3076_v49  ;;  %v1302_v4 = vmul.f32 %v2241_v17, %v3090_v2  ;;  %v3808_v17 = vld [vmem:[#allocation9_spill] sm:$0xff] }
 0x174   : > { %v1415_v63 = vadd.f32 %v1414_v8, %v1288_v60  ;;  %v2242_v8 = vld [vmem:[%s2327_s15 + $0x320] sm:$0xff] }
 0x175   : > { %v1482_v43 = vadd.f32 %v1481_v26, %v1469_v32  ;;  %v1303_v14 = vmul.f32 %v2242_v8, %v3098_v12  ;;  %v2243_v32 = vld [vmem:[%s2327_s15 + $0x328] sm:$0xff] }
 0x176   : > { %v1416_v33 = vadd.f32 %v1415_v63, %v1289_v7  ;;  %v1304_v41 = vmul.f32 %v2243_v32, %v3798_v40  ;;  %v2244_v63 = vld [vmem:[%s2327_s15 + $0x330] sm:$0xff] }
 0x177   : > { %1483 = vst [vmem:[#allocation2 + $0x3] sm:$0x1] %v1482_v43  ;;  %v3799_v43 = vld [vmem:[#allocation13_spill] sm:$0xff]  ;;  %v3809_v8 = vld [vmem:[#allocation10_spill] sm:$0xff] }
 0x178   : > { %v1417_v47 = vadd.f32 %v1416_v33, %v1290_v34  ;;  %v1305_v49 = vmul.f32 %v2244_v63, %v3799_v43  ;;  %v3800_v33 = vld [vmem:[#allocation15_spill] sm:$0xff]  ;;  %v3811_v40 = vld [vmem:[#allocation14_spill] sm:$0xff]  ;;  %v3813_v43 = vld [vmem:[#allocation20_spill] sm:$0xff] }
 0x17a   : > { %v1418_v59 = vadd.f32 %v1417_v47, %v1291_v50  ;;  %v2245_v50 = vld [vmem:[%s2327_s15 + $0x338] sm:$0xff] }
 0x17b   : > { %v1306_v2 = vmul.f32 %v2245_v50, %v3800_v33  ;;  %v3801_v47 = vld [vmem:[#allocation16_spill] sm:$0xff] }
 0x17c   : > { %v1419_v55 = vadd.f32 %v1418_v59, %v1292_v5  ;;  %v2246_v5 = vld [vmem:[%s2327_s15 + $0x340] sm:$0xff]  ;;  %v3802_v59 = vld [vmem:[#allocation18_spill] sm:$0xff] }
 0x17d   : > { %v1307_v12 = vmul.f32 %v2246_v5, %v3801_v47  ;;  %v3815_v50 = vld [vmem:[#allocation28_spill] sm:$0xff] }
 0x17e   : > { %v1420_v19 = vadd.f32 %v1419_v55, %v1293_v31  ;;  %v2247_v31 = vld [vmem:[%s2327_s15 + $0x348] sm:$0xff]  ;;  %v2248_v55 = vld [vmem:[%s2327_s15 + $0x350] sm:$0xff]  ;;  %v3818_v47 = vld [vmem:[#allocation24_spill] sm:$0xff] }
 0x17f   : > { %v1308_v16 = vmul.f32 %v2247_v31, %v3802_v59  ;;  %v3820_v31 = vld [vmem:[#allocation25_spill] sm:$0xff]  ;;  %v3821_v59 = vld [vmem:[#allocation32_spill] sm:$0xff] }
 0x180   : > { %v1421_v62 = vadd.f32 %v1420_v19, %v1294_v22 }
 0x182   : > { %v1422_v11 = vadd.f32 %v1421_v62, %v1295_v38  ;;  %v1309_v38 = vmul.f32 %v2248_v55, %v3803_v36  ;;  %v3823_v36 = vld [vmem:[#allocation27_spill] sm:$0xff] }
 0x184   : > { %v1423_v48 = vadd.f32 %v1422_v11, %v1296_v51  ;;  %v1310_v51 = vmul.f32 %v2249_v24, %v3178_v0  ;;  %v3824_v24 = vld [vmem:[#allocation30_spill] sm:$0xff] }
 0x186   : > { %v1424_v37 = vadd.f32 %v1423_v48, %v1297_v61  ;;  %v3804_v61 = vld [vmem:[#allocation21_spill] sm:$0xff] }
 0x187   : > { %v1311_v11 = vmul.f32 %v2250_v29, %v3804_v61  ;;  %v3825_v29 = vld [vmem:[#allocation33_spill] sm:$0xff] }
 0x188   : > { %v1425_v60 = vadd.f32 %v1424_v37, %v1298_v35  ;;  %v2251_v35 = vld [vmem:[%s2327_s15 + $0x368] sm:$0xff]  ;;  %v1329_v61 = vmul.f32 %v3384_v46, %v3825_v29  ;;  %v1504_v46 = vlaneseq (!%p1944_p5) }
 0x189   : > { %v1312_v48 = vmul.f32 %v2251_v35, %v3200_v52  ;;  %v1317_v52 = vmul.f32 %v3252_v18, %v3809_v8 }
 0x18a   : > { %v1426_v30 = vadd.f32 %v1425_v60, %v1299_v23  ;;  %v3805_v23 = vld [vmem:[#allocation6_spill] sm:$0xff] }
 0x18b   : > { %v1313_v37 = vmul.f32 %v3208_v27, %v3805_v23 }
 0x18c   : > { %v1427_v7 = vadd.f32 %v1426_v30, %v1300_v45  ;;  %v3806_v45 = vld [vmem:[#allocation7_spill] sm:$0xff] }
 0x18d   : > { %v1314_v60 = vmul.f32 %v3222_v1, %v3806_v45  ;;  %v1319_v1 = vmul.f32 %v3274_v6, %v3811_v40 }
 0x18e   : > { %v1428_v26 = vadd.f32 %v1427_v7, %v1301_v57  ;;  %v3807_v57 = vld [vmem:[#allocation8_spill] sm:$0xff] }
 0x18f   : > { %v1315_v0 = vmul.f32 %v3230_v21, %v3807_v57  ;;  %v3827_v57 = vld [vmem:[#allocation35_spill] sm:$0xff] }
 0x190   : > { %v1429_v34 = vadd.f32 %v1428_v26, %v1302_v4  ;;  %v1316_v4 = vmul.f32 %v3244_v15, %v3808_v17  ;;  %v3810_v26 = vld [vmem:[#allocation11_spill] sm:$0xff]  ;;  %v1321_v15 = vmul.f32 %v3296_v3, %v3813_v43  ;;  %v3604_v17 = vand.u32 (!%p1944_p5), 127, %v1504_v46 }
 0x191   : > { %v1318_v27 = vmul.f32 %v3266_v10, %v3810_v26 }
 0x192   : > { %v1430_v9 = vadd.f32 %v1429_v34, %v1303_v14  ;;  %v3812_v34 = vld [vmem:[#allocation17_spill] sm:$0xff]  ;;  %vm1731_vm1 = vcmp.lt.s32.totalorder (!%p1944_p5), %v3604_v17, 4 }
 0x193   : > { %v1320_v21 = vmul.f32 %v3288_v25, %v3812_v34  ;;  %v1325_v25 = vmul.f32 %v3821_v59, %v3820_v31 }
 0x194   : > { %v1431_v56 = vadd.f32 %v1430_v9, %v1304_v41  ;;  %v3814_v9 = vld [vmem:[#allocation22_spill] sm:$0xff] }
 0x195   : > { %v1322_v18 = vmul.f32 %v3815_v50, %v3814_v9  ;;  %v2296_v9 = vmov (!%p1944_p5), 1.0|1.0  }
 0x196   : > { %v1432_v20 = vadd.f32 %v1431_v56, %v1305_v49  ;;  %v3817_v56 = vld [vmem:[#allocation29_spill] sm:$0xff] }
 0x198   : > { %v1433_v22 = vadd.f32 %v1432_v20, %v1306_v2  ;;  %v3816_v2 = vld [vmem:[#allocation23_spill] sm:$0xff] }
 0x199   : > { %v1323_v10 = vmul.f32 %v3817_v56, %v3816_v2 }
 0x19a   : > { %v1434_v19 = vadd.f32 %v1433_v22, %v1307_v12  ;;  %v3819_v12 = vld [vmem:[#allocation31_spill] sm:$0xff]  ;;  %v3822_v22 = vld [vmem:[#allocation26_spill] sm:$0xff] }
 0x19b   : > { %v1324_v6 = vmul.f32 %v3819_v12, %v3818_v47  ;;  %v1326_v3 = vmul.f32 %v3354_v39, %v3822_v22 }
 0x19c   : > { %v1435_v62 = vadd.f32 %v1434_v19, %v1308_v16 }
 0x19e   : > { %v1436_v42 = vadd.f32 %v1435_v62, %v1309_v38  ;;  %v1327_v38 = vmul.f32 %v3362_v13, %v3823_v36 }
 0x1a0   : > { %v1437_v53 = vadd.f32 %v1436_v42, %v1310_v51  ;;  %v1328_v51 = vmul.f32 %v3376_v44, %v3824_v24  ;;  %v3826_v42 = vld [vmem:[#allocation34_spill] sm:$0xff] }
 0x1a1   : > { %v1330_v35 = vmul.f32 %v3395_v54, %v3826_v42  ;;  %v3602_v54 = vshrl.u32 (!%p1944_p5), %v1504_v46, 7 }
 0x1a2   : > { %v1438_v58 = vadd.f32 %v1437_v53, %v1311_v11 }
 0x1a3   : > { %v1527_v8 = vand.u32 (!%p1944_p5), 3, %v3602_v54  ;;  %v1509_v26 = vadd.s32 (!%p1944_p5), 32, %v3602_v54  ;;  %v1513_v43 = vadd.s32 (!%p1944_p5), 64, %v3602_v54  ;;  %v1516_v2 = vadd.s32 (!%p1944_p5), 88, %v3602_v54 }
 0x1a4   : > { %v1439_v28 = vadd.f32 %v1438_v58, %v1312_v48  ;;  %v1517_v47 = vadd.s32 (!%p1944_p5), 96, %v3602_v54  ;;  %v1519_v22 = vadd.s32 (!%p1944_p5), 112, %v3602_v54 }
 0x1a5   : > { %vm1715_vm2 = vcmp.eq.s32.totalorder (!%p1944_p5), %v1527_v8, %v3604_v17  ;;  %v1555_v34 = vand.u32 (!%p1944_p5), 3, %v1509_v26 }
 0x1a6   : > { %v1440_v30 = vadd.f32 %v1439_v28, %v1313_v37  ;;  %v1484_v28 = vld [vmem:[#allocation2 + $0x4] sm:$0x1]  ;;  %vm1732_vm3 = vmand (!%p1944_p5), %vm1715_vm2, %vm1731_vm1  ;;  %v1611_v59 = vand.u32 (!%p1944_p5), 3, %v1517_v47 }
 0x1a7   : > { %vm1719_vm10 = vcmp.eq.s32.totalorder (!%p1944_p5), %v1555_v34, %v3604_v17 }
 0x1a8   : > { %v1441_v7 = vadd.f32 %v1440_v30, %v1314_v60  ;;  %v2293_v30 = vmov (!%p1944_p5), 0.0|0.0   ;;  %vm3637_vm14 = vmand (!%p1944_p5), %vm1719_vm10, %vm1731_vm1 }
 0x1a9   : > { %2017 = vmatprep.subr.bf16.mxu0 (!%p1944_p5), %v2293_v30 }
 0x1aa   : > { %v1442_v14 = vadd.f32 %v1441_v7, %v1315_v0  ;;  %v1506_v7 = vadd.s32 (!%p1944_p5), 8, %v3602_v54 }
 0x1ac   : > { %v1443_v32 = vadd.f32 %v1442_v14, %v1316_v4  ;;  %v2295_v4 = vmov (!%p1944_p5), 0.0   ;;  %v1508_v14 = vadd.s32 (!%p1944_p5), 24, %v3602_v54 }
 0x1ad   : > { %2014 = vmatprep.mubr.msk.f32.mxu0 (!%p1944_p5), %vm2294_vm0, %v2295_v4 }
 0x1ae   : > { %v1444_v41 = vadd.f32 %v1443_v32, %v1317_v52  ;;  %v1507_v52 = vadd.s32 (!%p1944_p5), 16, %v3602_v54  ;;  %v1534_v32 = vand.u32 (!%p1944_p5), 3, %v1506_v7 }
 0x1b0   : > { %v1445_v63 = vadd.f32 %v1444_v41, %v1318_v27  ;;  %v1510_v27 = vadd.s32 (!%p1944_p5), 40, %v3602_v54  ;;  %v1541_v40 = vand.u32 (!%p1944_p5), 3, %v1507_v52  ;;  %v1548_v41 = vand.u32 (!%p1944_p5), 3, %v1508_v14 }
 0x1b1   : > { %vm1716_vm4 = vcmp.eq.s32.totalorder (!%p1944_p5), %v1534_v32, %v3604_v17 }
 0x1b2   : > { %v1446_v49 = vadd.f32 %v1445_v63, %v1319_v1  ;;  %v1511_v1 = vadd.s32 (!%p1944_p5), 48, %v3602_v54  ;;  %vm1717_vm5 = vcmp.eq.s32.totalorder (!%p1944_p5), %v1541_v40, %v3604_v17  ;;  %v1562_v63 = vand.u32 (!%p1944_p5), 3, %v1510_v27  ;;  %vm1733_vm6 = vmand (!%p1944_p5), %vm1716_vm4, %vm1731_vm1 }
 0x1b3   : > { %vm1718_vm7 = vcmp.eq.s32.totalorder (!%p1944_p5), %v1548_v41, %v3604_v17  ;;  %vm2018_vm8 = vmpackc.low (!%p1944_p5), %vm1733_vm6, %vm1732_vm3 }
 0x1b4   : > { %v1447_v33 = vadd.f32 %v1446_v49, %v1320_v21  ;;  %v1512_v21 = vadd.s32 (!%p1944_p5), 56, %v3602_v54  ;;  %v1514_v49 = vadd.s32 (!%p1944_p5), 72, %v3602_v54  ;;  %2019 = vmatpush3.bf16.msk.msra.mxu0 (!%p1944_p5), %vm2018_vm8, %v2296_v9  ;;  %vm1734_vm9 = vmand (!%p1944_p5), %vm1717_vm5, %vm1731_vm1  ;;  %vm1720_vm12 = vcmp.eq.s32.totalorder (!%p1944_p5), %v1562_v63, %v3604_v17 }
 0x1b5   : > { %2020 = vmatprep.subr.bf16.mxu0 (!%p1944_p5), %v2293_v30  ;;  %vm1735_vm11 = vmand (!%p1944_p5), %vm1718_vm7, %vm1731_vm1 }
 0x1b6   : > { %v1448_v5 = vadd.f32 %v1447_v33, %v1321_v15  ;;  %v1569_v15 = vand.u32 (!%p1944_p5), 3, %v1511_v1  ;;  %v1576_v50 = vand.u32 (!%p1944_p5), 3, %v1512_v21  ;;  %vm2021_vm13 = vmpackc.low (!%p1944_p5), %vm1735_vm11, %vm1734_vm9  ;;  %v1583_v33 = vand.u32 (!%p1944_p5), 3, %v1513_v43 }
 0x1b7   : > { %vm1737_vm0 = vmand (!%p1944_p5), %vm1720_vm12, %vm1731_vm1 }
 0x1b8   : > { %v1449_v20 = vadd.f32 %v1448_v5, %v1322_v18  ;;  %v1515_v18 = vadd.s32 (!%p1944_p5), 80, %v3602_v54  ;;  %vm1721_vm15 = vcmp.eq.s32.totalorder (!%p1944_p5), %v1569_v15, %v3604_v17  ;;  %2022 = vmatpush3.bf16.msk.msra.mxu0 (!%p1944_p5), %vm2021_vm13, %v2296_v9  ;;  %vm1722_vm2 = vcmp.eq.s32.totalorder (!%p1944_p5), %v1576_v50, %v3604_v17  ;;  %vm2024_vm3 = vmpackc.low (!%p1944_p5), %vm1737_vm0, %vm3637_vm14 }
 0x1b9   : > { %2023 = vmatprep.subr.bf16.mxu0 (!%p1944_p5), %v2293_v30  ;;  %vm3652_vm4 = vmand (!%p1944_p5), %vm1721_vm15, %vm1731_vm1  ;;  %vm1723_vm5 = vcmp.eq.s32.totalorder (!%p1944_p5), %v1583_v33, %v3604_v17  ;;  %vm1727_vm0 = vcmp.eq.s32.totalorder (!%p1944_p5), %v1611_v59, %v3604_v17 }
 0x1ba   : > { %v1450_v16 = vadd.f32 %v1449_v20, %v1323_v10  ;;  %v1590_v10 = vand.u32 (!%p1944_p5), 3, %v1514_v49  ;;  %v1597_v5 = vand.u32 (!%p1944_p5), 3, %v1515_v18  ;;  %v1518_v20 = vadd.s32 (!%p1944_p5), 104, %v3602_v54  ;;  %vm1739_vm6 = vmand (!%p1944_p5), %vm1722_vm2, %vm1731_vm1 }
 0x1bb   : > { %vm2027_vm8 = vmpackc.low (!%p1944_p5), %vm1739_vm6, %vm3652_vm4 }
 0x1bc   : > { %v1451_v55 = vadd.f32 %v1450_v16, %v1324_v6  ;;  %v1604_v6 = vand.u32 (!%p1944_p5), 3, %v1516_v2  ;;  %vm1724_vm7 = vcmp.eq.s32.totalorder (!%p1944_p5), %v1590_v10, %v3604_v17  ;;  %2025 = vmatpush3.bf16.msk.msra.mxu0 (!%p1944_p5), %vm2024_vm3, %v2296_v9  ;;  %vm3667_vm9 = vmand (!%p1944_p5), %vm1723_vm5, %vm1731_vm1  ;;  %vm1725_vm10 = vcmp.eq.s32.totalorder (!%p1944_p5), %v1597_v5, %v3604_v17 }
 0x1bd   : > { %2026 = vmatprep.subr.bf16.mxu0 (!%p1944_p5), %v2293_v30  ;;  %vm3674_vm11 = vmand (!%p1944_p5), %vm1724_vm7, %vm1731_vm1  ;;  %v1618_v16 = vand.u32 (!%p1944_p5), 3, %v1518_v20 }
 0x1be   : > { %v1452_v19 = vadd.f32 %v1451_v55, %v1325_v25  ;;  %vm1726_vm12 = vcmp.eq.s32.totalorder (!%p1944_p5), %v1604_v6, %v3604_v17  ;;  %vm2030_vm13 = vmpackc.low (!%p1944_p5), %vm3674_vm11, %vm3667_vm9  ;;  %v1625_v55 = vand.u32 (!%p1944_p5), 3, %v1519_v22 }
 0x1bf   : > { %vm1742_vm14 = vmand (!%p1944_p5), %vm1725_vm10, %vm1731_vm1  ;;  %vm1728_vm2 = vcmp.eq.s32.totalorder (!%p1944_p5), %v1618_v16, %v3604_v17 }
 0x1c0   : > { %v1453_v62 = vadd.f32 %v1452_v19, %v1326_v3  ;;  %v1520_v3 = vadd.s32 (!%p1944_p5), 120, %v3602_v54  ;;  %2028 = vmatpush3.bf16.msk.msra.mxu0 (!%p1944_p5), %vm2027_vm8, %v2296_v9  ;;  %vm1743_vm15 = vmand (!%p1944_p5), %vm1726_vm12, %vm1731_vm1  ;;  %vm1729_vm6 = vcmp.eq.s32.totalorder (!%p1944_p5), %v1625_v55, %v3604_v17  ;;  %vm1875_vm12 = vcmask (!%p1944_p5), 4100  }
 0x1c1   : > { %2029 = vmatprep.subr.bf16.mxu0 (!%p1944_p5), %v2293_v30  ;;  %vm2033_vm3 = vmpackc.low (!%p1944_p5), %vm1743_vm15, %vm1742_vm14 }
 0x1c2   : > { %v1454_v11 = vadd.f32 %v1453_v62, %v1327_v38  ;;  %v1632_v36 = vand.u32 (!%p1944_p5), 3, %v1520_v3  ;;  %vm1744_vm4 = vmand (!%p1944_p5), %vm1727_vm0, %vm1731_vm1 }
 0x1c3   : > { %vm1745_vm5 = vmand (!%p1944_p5), %vm1728_vm2, %vm1731_vm1 }
 0x1c4   : > { %v1455_v48 = vadd.f32 %v1454_v11, %v1328_v51  ;;  %2031 = vmatpush3.bf16.msk.msra.mxu0 (!%p1944_p5), %vm2030_vm13, %v2296_v9  ;;  %vm1730_vm7 = vcmp.eq.s32.totalorder (!%p1944_p5), %v1632_v36, %v3604_v17  ;;  %vm2036_vm8 = vmpackc.low (!%p1944_p5), %vm1745_vm5, %vm1744_vm4 }
 0x1c5   : > { %2032 = vmatprep.subr.bf16.mxu0 (!%p1944_p5), %v2293_v30  ;;  %vm1746_vm9 = vmand (!%p1944_p5), %vm1729_vm6, %vm1731_vm1 }
 0x1c6   : > { %v1456_v53 = vadd.f32 %v1455_v48, %v1329_v61  ;;  %vm1747_vm10 = vmand (!%p1944_p5), %vm1730_vm7, %vm1731_vm1  ;;  %vm1870_vm1 = vcmask (!%p1944_p5), 1044484  }
 0x1c7   : > { %vm2039_vm11 = vmpackc.low (!%p1944_p5), %vm1747_vm10, %vm1746_vm9 }
 0x1c8   : > { %v1457_v23 = vadd.f32 %v1456_v53, %v1330_v35  ;;  %2034 = vmatpush3.bf16.msk.msra.mxu0 (!%p1944_p5), %vm2033_vm3, %v2296_v9 }
 0x1c9   : > { %2035 = vmatprep.subr.bf16.mxu0 (!%p1944_p5), %v2293_v30 }
 0x1ca   : > { %v1458_v39 = vrot.slane %v1457_v23, 4 }
 0x1cc   : > { %v1459_v37 = vadd.f32 %v1458_v39, %v1457_v23  ;;  %2037 = vmatpush3.bf16.msk.msra.mxu0 (!%p1944_p5), %vm2036_vm8, %v2296_v9 }
 0x1cd   : > { %2038 = vmatprep.subr.bf16.mxu0 (!%p1944_p5), %v2293_v30 }
 0x1ce   : > { %v1460_v58 = vrot.slane %v1459_v37, 2 }
 0x1d0   : > { %v1461_v45 = vadd.f32 %v1460_v58, %v1459_v37  ;;  %2040 = vmatpush3.bf16.msk.msra.mxu0 (!%p1944_p5), %vm2039_vm11, %v2296_v9 }
 0x1d2   : > { %v1462_v13 = vrot.slane %v1461_v45, 1 }
 0x1d4   : > { %v1463_v60 = vadd.f32 %v1462_v13, %v1461_v45  ;;  %1502 = sbr.rel (%p1944_p5) target bundleno = 877 (0x36d), region = 36 }
 0x1d6   : > { %v1471_v44 = vsub.f32 %v1463_v60, %v3827_v57 }
 0x1d8   : > { %v1485_v0 = vadd.f32 %v1484_v28, %v1471_v44 }
 0x1da   : > { %1486 = vst [vmem:[#allocation2 + $0x4] sm:$0x1] %v1485_v0 }
 0x1e1   : > { %v1503_v38 = vld [vmem:[#allocation2] sm:$0xff] }
 0x1e2   : > { %2015 = vmatmul.mubr.f32.vlgmr.msra.gmra.mrb[0].mxu0 %v1503_v38 }
 0x2b5   : > { %v1830_v19 = vpop.f32.mrb[0].mxu0 }
 0x2b6   : > { %v1834_v24 = vmul.f32 0.015625, %v1830_v19  ;;  %v2016_v51 = vpop.f32.mrb[1].mxu0 }
 0x2b8   : > { %v1835_v62 = vmul.f32 64.0, %v1834_v24  ;;  %v1847_v29 = vrot.slane %v1834_v24, 1 }
 0x2ba   : > { %v1836_v61 = vmul.f32 %v1835_v62, %v1834_v24  ;;  %v1849_v42 = vmul.f32 %v1847_v29, %v1835_v62 }
 0x2bc   : > { %v1838_v11 = vrot.slane %v1836_v61, 3  ;;  %v1851_v53 = vrot.slane %v1849_v42, 1 }
 0x2be   : > { %v1840_v35 = vsub.f32 %v1830_v19, %v1838_v11  ;;  %v1853_v37 = vsub.f32 %v1830_v19, %v1851_v53 }
 0x2c0   : > { %v1841_v48 = vmul.f32 1024.0, %v1840_v35  ;;  %v1854_v13 = vmul.f32 1024.0, %v1853_v37 }
 0x2c2   : > { %v1843_v23 = vrot.slane %v1841_v48, 3  ;;  %v1856_v60 = vrot.slane %v1854_v13, 3 }
 0x2c4   : > { %v1845_v39 = vadd.f32 %v1843_v23, %v1830_v19  ;;  %v1858_v28 = vadd.f32 %v1856_v60, %v1830_v19 }
 0x2c6   : > { %v1859_v58 = vmul.f32 1.5258789e-05, %v1845_v39  ;;  %v1860_v44 = vmul.f32 1.5258789e-05, %v1858_v28 }
 0x2c8   : > { %v1861_v45 = vadd.f32 1e-08, %v1859_v58 }
 0x2ca   : > { %2252 = vrsqrt.f32 %v1861_v45 }
 0x2d4   : > { %v2253_v57 = vpop.eup %2252 }
 0x2d5   : > { %v1864_v0 = vrot.slane %v2253_v57, 6  ;;  %v1867_v30 = vrot.slane %v2253_v57, 7 }
 0x2d7   : > { %v1866_v46 = vmul.f32 %v1864_v0, %v1860_v44 }
 0x2d9   : > { %v1869_v54 = vmul.f32 %v1867_v30, %v1866_v46 }
 0x2db   : > { %v1871_v17 = vsel %vm1870_vm1, %v1869_v54, 0.0 }
 0x2dc   : > { %1872 = vadd.xlane.f32.xlu0 %v1871_v17 }
 0x369   : > { %v1873_v4 = vpop.xlane.xlu0 %1872 }
 0x36a   : > { %v1874_v7 = vmul.f32 -0.25, %v1873_v4 }
 0x36c   : > { %1876 = vst.msk [vmem:[#allocation3 - $0x4] sm:$0x10] %vm1875_vm12, %v1874_v7 }
 0x36d PF: > { %p2045_p6 = scmp.eq.s32.totalorder %s2319_s10, 1  ;;  %s2297_s19 = smov [#allocation3]  }
 0x36e   : > { %s1884_s20 = sshll.u32 %s2297_s19, 4  ;;  %s1885_s20 = int_to_ptr.vmem [resolvable:$true] %s1884_s20 }
 0x36f   : > { %s2254_s21 = scalar_lea.vmem %s1885_s20, 16  ;;  %s2260_s22 = scalar_lea.vmem %s1885_s20, 32 }
 0x370   : > { %p2255_p7 = scmp.ne.s32.totalorder %s1885_s20, %s2254_s21  ;;  %p2261_p10 = scmp.lt.s32.totalorder %s1885_s20, %s1885_s20 }
 0x371   : > { %p2262_p11 = scmp.lt.s32.totalorder %s2260_s22, %s2254_s21 }
 0x372   : > { %p2256_p8 = pnand %p2255_p7, %p2045_p6 }
 0x373   : > { %p2263_p12 = por %p2262_p11, %p2261_p10 }
 0x374   : > { %p2257_p9 = pneg %p2256_p8 }
 0x376   : > { %p2264_p13 = pnand %p2263_p12, %p2257_p9 }
 0x378   : > { %2267 = shalt.err (!%p2264_p13)
}
 0x379   : > { %s2268_s25 = scalar_lea.hbm %s3738_s2, 16 }
 0x37a   : > { %p2269_p0 = scmp.ne.s32.totalorder %s3738_s2, %s2268_s25  ;;  %p2274_p3 = scmp.lt.u32.totalorder %s2268_s25, %s3738_s2 }
 0x37c   : > { %p2270_p1 = pnand %p2269_p0, %p2045_p6 }
 0x37e   : > { %p2271_p2 = pneg %p2270_p1 }
 0x380   : > { %p2276_p4 = pnand %p2274_p3, %p2271_p2 }
 0x382   : > { %2279 = shalt.err (!%p2276_p4)
}
 0x383   : > { %2042 = dma.vmem_to_hbm [thread:$0]  (%p2045_p6), %s1885_s20, 16, %s3738_s2, [#allocation4]  }
 0x384   : > { %2285 = dma.done.wait (%p2045_p6), [#allocation4], 16  }
 0x385   : > { %2287 = vsyncadd (%p2045_p6), [#allocation4], 4294967280 }
 0x386 PF: > { %s13_s9 = sadd.s32 1, %s2290_s9  }
 0x387   : > { %p10_p5 = scmp.ge.s32.totalorder %s13_s9, 4  }
 0x389   :  { %12 = sbr.rel (!%p10_p5) target bundleno = 1 (0x1), region = 66 }
 0x390   :  { %1897 = vsyncpa [#allocation4], 1 }
 0x391   :  { %1899 = vsyncpa [#allocation4 + $0x1], 1 }

</bundles_post_ra>
